<compile_context>
chip_gen: v7x
topology: tpu7x:2x2x1
jax: 0.10.0
libtpu: 0.0.40
codegen_flags: <defaults>
</compile_context>

<pallas_src>
import functools

import jax
import jax.numpy as jnp
from jax.experimental import pallas as pl
from jax.experimental.pallas import tpu as pltpu

_HID = 512
_OUT = 784 * 3          # 2352 — torch out_features
_OUT_PAD = 2432         # 19 * 128 — lane-dense output slab / full MXU N tiles
_BATCH_TILE = 256       # sized so 2x double-buffered (TB, 2432) f32 tiles + resident
                        # weights stay well under v7x's 32 MiB default scoped VMEM


def _decoder_kernel(z_ref, w1_ref, b1_ref, w2_ref, b2_ref, o_ref):
    # linear1: K = latent (tiny) — keep f32, negligible cost
    h = jnp.dot(z_ref[...], w1_ref[...], preferred_element_type=jnp.float32)
    h = jnp.maximum(h + b1_ref[...], 0.0)                       # bias + ReLU (f32 VPU)
    # linear2: native bf16 MXU matmul with f32 accumulation (W2 stored bf16)
    y = jnp.dot(h.astype(w2_ref.dtype), w2_ref[...],
                preferred_element_type=jnp.float32) + b2_ref[...]
    o_ref[...] = jax.nn.sigmoid(y)                              # f32 EUP sigmoid


@functools.partial(jax.jit, static_argnames=("batch_tile",))
def cont_decoder_forward(z, w1, b1, w2, b2, *, batch_tile=_BATCH_TILE):
    """z: (B, latent) f32; w1 (latent,512) f32; b1 (1,512) f32;
    w2 (512,2352) bf16; b2 (1,2352) f32  ->  (B, 3, 28, 28) f32."""
    B, latent = z.shape

    # Lane-pad the wide feature dim 2352 -> 2432; zeros are sliced off below.
    w2p = jnp.pad(w2, ((0, 0), (0, _OUT_PAD - _OUT)))
    b2p = jnp.pad(b2, ((0, 0), (0, _OUT_PAD - _OUT)))

    # Batch tiling: single full-array block for small B (no per-step overhead),
    # otherwise (TB, *) tiles so the z-load / output-writeback DMAs pipeline
    # against the matmuls and tiles shard across v7x's two TensorCores.
    if B <= batch_tile:
        tb, bp, zp = B, B, z
    else:
        tb = batch_tile
        bp = pl.cdiv(B, tb) * tb
        zp = jnp.pad(z, ((0, bp - B), (0, 0)))
    grid = (bp // tb,)

    cost = pl.CostEstimate(
        flops=2 * bp * (latent * _HID + _HID * _OUT_PAD),
        transcendentals=bp * _OUT_PAD,
        bytes_accessed=(w1.size * 4 + b1.size * 4 + w2p.size * 2 + b2p.size * 4
                        + zp.size * 4 + bp * _OUT_PAD * 4),
    )

    flat = pl.pallas_call(
        _decoder_kernel,
        out_shape=jax.ShapeDtypeStruct((bp, _OUT_PAD), jnp.float32),
        grid_spec=pltpu.PrefetchScalarGridSpec(
            num_scalar_prefetch=0,
            grid=grid,
            in_specs=[
                pl.BlockSpec((tb, latent), lambda i: (i, 0)),       # z batch tile
                pl.BlockSpec((latent, _HID), lambda i: (0, 0)),     # W1 (VMEM-resident)
                pl.BlockSpec((1, _HID), lambda i: (0, 0)),          # b1 (VMEM-resident)
                pl.BlockSpec((_HID, _OUT_PAD), lambda i: (0, 0)),   # W2 bf16 (resident)
                pl.BlockSpec((1, _OUT_PAD), lambda i: (0, 0)),      # b2 (VMEM-resident)
            ],
            out_specs=pl.BlockSpec((tb, _OUT_PAD), lambda i: (i, 0)),
        ),
        compiler_params=pltpu.CompilerParams(
            dimension_semantics=("parallel",)),
        cost_estimate=cost,
    )(zp, w1, b1, w2p, b2p)

    return flat[:B, :_OUT].reshape((-1, 3, 28, 28))


def init_params(latent_dims, key):
    """Deterministic init mimicking nn.Linear's U(-1/sqrt(fan_in), 1/sqrt(fan_in))."""
    k1, k2, k3, k4 = jax.random.split(key, 4)
    lim1 = 1.0 / jnp.sqrt(jnp.float32(latent_dims))
    lim2 = 1.0 / jnp.sqrt(jnp.float32(_HID))
    # stored as (in, out) == transpose of torch's (out, in)
    w1 = jax.random.uniform(k1, (latent_dims, _HID), jnp.float32, -lim1, lim1)
    b1 = jax.random.uniform(k2, (1, _HID), jnp.float32, -lim1, lim1)
    # W2 in bf16: the kernel is weight-bandwidth bound; bf16 halves the big DMA
    w2 = jax.random.uniform(k3, (_HID, _OUT), jnp.float32, -lim2, lim2).astype(jnp.bfloat16)
    b2 = jax.random.uniform(k4, (1, _OUT), jnp.float32, -lim2, lim2)
    return w1, b1, w2, b2


def _reference(z, w1, b1, w2, b2):
    """Pure-JAX reference with the same numerics as the kernel
    (f32 linear1, bf16 MXU linear2 with f32 accumulation)."""
    h = jnp.maximum(z @ w1 + b1, 0.0)
    y = jnp.dot(h.astype(jnp.bfloat16), w2,
                preferred_element_type=jnp.float32) + b2
    return jax.nn.sigmoid(y).reshape((-1, 3, 28, 28))


if __name__ == "__main__":
    latent_dims = 8
    key = jax.random.PRNGKey(0)
    kz, kp = jax.random.split(key)
    w1, b1, w2, b2 = init_params(latent_dims, kp)

    # --- small batch: single full-array block (no grid-step overhead) ---
    z_small = jax.random.normal(kz, (2, latent_dims), dtype=jnp.float32)
    out_small = jax.block_until_ready(cont_decoder_forward(z_small, w1, b1, w2, b2))
    assert out_small.shape == (2, 3, 28, 28), out_small.shape
    assert bool(jnp.all((out_small > 0.0) & (out_small < 1.0)))
    ref_small = _reference(z_small, w1, b1, w2, b2)
    assert bool(jnp.allclose(out_small, ref_small, atol=1e-4, rtol=1e-4)), \
        float(jnp.max(jnp.abs(out_small - ref_small)))
    # loose check vs full-f32 torch semantics (bf16 W2 drift only)
    ref_f32 = jax.nn.sigmoid(
        jnp.maximum(z_small @ w1 + b1, 0.0) @ w2.astype(jnp.float32) + b2
    ).reshape((-1, 3, 28, 28))
    assert bool(jnp.allclose(out_small, ref_f32, atol=5e-2))

    # --- larger batch: exercises the pipelined / megacore-parallel batch grid ---
    z_big = jax.random.normal(kz, (512, latent_dims), dtype=jnp.float32)
    out_big = jax.block_until_ready(cont_decoder_forward(z_big, w1, b1, w2, b2))
    assert out_big.shape == (512, 3, 28, 28), out_big.shape
    ref_big = _reference(z_big, w1, b1, w2, b2)
    assert bool(jnp.allclose(out_big, ref_big, atol=1e-4, rtol=1e-4)), \
        float(jnp.max(jnp.abs(out_big - ref_big)))

    print("KERNEL_OK")
</pallas_src>

<mosaic_0001>
module attributes {stable_mosaic.version = 11 : i64} {
  func.func @_decoder_kernel(%arg0: i32, %arg1: memref<2x8xf32, #tpu.memory_space<vmem>>, %arg2: memref<8x512xf32, #tpu.memory_space<vmem>>, %arg3: memref<1x512xf32, #tpu.memory_space<vmem>>, %arg4: memref<512x2432xbf16, #tpu.memory_space<vmem>>, %arg5: memref<1x2432xf32, #tpu.memory_space<vmem>>, %arg6: memref<2x2432xf32, #tpu.memory_space<vmem>>) attributes {dimension_semantics = [#tpu.dimension_semantics<parallel>], iteration_bounds = array<i64: 1>, scalar_prefetch = 0 : i64, scratch_operands = 0 : i64, tpu.core_type = #tpu.core_type<tc>, window_params = [{transform_indices = @transform_0, window_bounds = array<i64: 2, 8>}, {pipeline_mode = #tpu.pipeline_mode<synchronous>, transform_indices = @transform_1, window_bounds = array<i64: 8, 512>}, {pipeline_mode = #tpu.pipeline_mode<synchronous>, transform_indices = @transform_2, window_bounds = array<i64: 1, 512>}, {pipeline_mode = #tpu.pipeline_mode<synchronous>, transform_indices = @transform_3, window_bounds = array<i64: 512, 2432>}, {pipeline_mode = #tpu.pipeline_mode<synchronous>, transform_indices = @transform_4, window_bounds = array<i64: 1, 2432>}, {transform_indices = @transform_5, window_bounds = array<i64: 2, 2432>}]} {
    %c0 = arith.constant 0 : index
    %c0_0 = arith.constant 0 : index
    %0 = vector.load %arg1[%c0, %c0_0] : memref<2x8xf32, #tpu.memory_space<vmem>>, vector<2x8xf32>
    %c0_1 = arith.constant 0 : index
    %c0_2 = arith.constant 0 : index
    %1 = vector.load %arg2[%c0_1, %c0_2] : memref<8x512xf32, #tpu.memory_space<vmem>>, vector<8x512xf32>
    %cst = arith.constant dense<0.000000e+00> : vector<2x512xf32>
    %2 = tpu.matmul %0, %1, %cst {dimension_numbers = #tpu.dot_dimension_numbers<[1], [0], [0], [1], [0, 0, 1, 1], [], []>} : vector<2x8xf32>, vector<8x512xf32>, vector<2x512xf32> -> vector<2x512xf32>
    %c0_3 = arith.constant 0 : index
    %c0_4 = arith.constant 0 : index
    %3 = vector.load %arg3[%c0_3, %c0_4] : memref<1x512xf32, #tpu.memory_space<vmem>>, vector<1x512xf32>
    %4 = vector.broadcast %3 : vector<1x512xf32> to vector<2x512xf32>
    %5 = arith.addf %2, %4 : vector<2x512xf32>
    %cst_5 = arith.constant 0.000000e+00 : f32
    %6 = vector.broadcast %cst_5 : f32 to vector<2x512xf32>
    %7 = arith.maximumf %5, %6 : vector<2x512xf32>
    %8 = arith.truncf %7 : vector<2x512xf32> to vector<2x512xbf16>
    %c0_6 = arith.constant 0 : index
    %c0_7 = arith.constant 0 : index
    %9 = vector.load %arg4[%c0_6, %c0_7] : memref<512x2432xbf16, #tpu.memory_space<vmem>>, vector<512x2432xbf16>
    %cst_8 = arith.constant dense<0.000000e+00> : vector<2x2432xf32>
    %10 = tpu.matmul %8, %9, %cst_8 {dimension_numbers = #tpu.dot_dimension_numbers<[1], [0], [0], [1], [0, 0, 1, 1], [], []>} : vector<2x512xbf16>, vector<512x2432xbf16>, vector<2x2432xf32> -> vector<2x2432xf32>
    %c0_9 = arith.constant 0 : index
    %c0_10 = arith.constant 0 : index
    %11 = vector.load %arg5[%c0_9, %c0_10] : memref<1x2432xf32, #tpu.memory_space<vmem>>, vector<1x2432xf32>
    %12 = vector.broadcast %11 : vector<1x2432xf32> to vector<2x2432xf32>
    %13 = arith.addf %10, %12 : vector<2x2432xf32>
    %14 = arith.negf %13 : vector<2x2432xf32>
    %15 = math.exp %14 : vector<2x2432xf32>
    %cst_11 = arith.constant 1.000000e+00 : f32
    %16 = vector.broadcast %cst_11 : f32 to vector<2x2432xf32>
    %17 = arith.addf %16, %15 : vector<2x2432xf32>
    %18 = arith.divf %16, %17 : vector<2x2432xf32>
    %c0_12 = arith.constant 0 : index
    %c0_13 = arith.constant 0 : index
    %19 = vector.load %arg6[%c0_12, %c0_13] : memref<2x2432xf32, #tpu.memory_space<vmem>>, vector<2x2432xf32>
    tpu.vector_store %arg6[%c0_12, %c0_13], %18 {strides = array<i32>} : memref<2x2432xf32, #tpu.memory_space<vmem>>, vector<2x2432xf32>,
    return
  }
  func.func @transform_0(%arg0: i32) -> (i32, i32) {
    %c0_i32 = arith.constant 0 : i32
    %c0_i32_0 = arith.constant 0 : i32
    return %arg0, %c0_i32 : i32, i32
  }
  func.func @transform_1(%arg0: i32) -> (i32, i32) {
    %c0_i32 = arith.constant 0 : i32
    %c0_i32_0 = arith.constant 0 : i32
    %c0_i32_1 = arith.constant 0 : i32
    return %c0_i32, %c0_i32_0 : i32, i32
  }
  func.func @transform_2(%arg0: i32) -> (i32, i32) {
    %c0_i32 = arith.constant 0 : i32
    %c0_i32_0 = arith.constant 0 : i32
    %c0_i32_1 = arith.constant 0 : i32
    return %c0_i32, %c0_i32_0 : i32, i32
  }
  func.func @transform_3(%arg0: i32) -> (i32, i32) {
    %c0_i32 = arith.constant 0 : i32
    %c0_i32_0 = arith.constant 0 : i32
    %c0_i32_1 = arith.constant 0 : i32
    return %c0_i32, %c0_i32_0 : i32, i32
  }
  func.func @transform_4(%arg0: i32) -> (i32, i32) {
    %c0_i32 = arith.constant 0 : i32
    %c0_i32_0 = arith.constant 0 : i32
    %c0_i32_1 = arith.constant 0 : i32
    return %c0_i32, %c0_i32_0 : i32, i32
  }
  func.func @transform_5(%arg0: i32) -> (i32, i32) {
    %c0_i32 = arith.constant 0 : i32
    %c0_i32_0 = arith.constant 0 : i32
    return %arg0, %c0_i32 : i32, i32
  }
}

</mosaic_0001>

<bundles_post_ra>
// kernel: cont_decoder_forward.1
= control target key start
LH: loop header
LB: loop body
LE: loop exit
PB: predicated region body
PF: predicated region fallthrough
CT: control target
= control target key end

     0   :  { %v6765_v2 = vmov 0.0   ;;  %vm48_vm0 = vcmask 64512   ;;  %s8804_s1 = inlined_call_operand.vmem [shape: f32[8,512], index: 1, kind: input, shape index: {}]   ;;  %s8805_s0 = inlined_call_operand.vmem [shape: f32[2,8], index: 0, kind: input, shape index: {}]   ;;  %s8806_s3 = inlined_call_operand.vmem [shape: bf16[512,2432], index: 3, kind: input, shape index: {}]   ;;  %s8807_s2 = inlined_call_operand.vmem [shape: f32[1,512], index: 2, kind: input, shape index: {}]   ;;  %s8808_s4 = inlined_call_operand.vmem [shape: f32[1,2432], index: 4, kind: input, shape index: {}]   ;;  %s8809_s5 = inlined_call_operand.vmem [shape: f32[2,2432], index: 5, kind: output, shape index: {}]  }
   0x1   :  { %v23_v0 = vld [vmem:[%s8804_s1 + $0x8] sm:$0xff]  ;;  %v22_v1 = vld [vmem:[%s8804_s1] sm:$0xff]  ;;  %116 = vmatprep.mubr.f32.mxu1 %v6765_v2  ;;  %v25_v4 = vld [vmem:[%s8804_s1 + $0x18] sm:$0xff] }
   0x2   :  { %v21_v3 = vld [vmem:[%s8805_s0] sm:$0x3]  ;;  %52 = vmatprep.subr.mxu1 %v23_v0  ;;  %v24_v5 = vld [vmem:[%s8804_s1 + $0x10] sm:$0xff]  ;;  %v5797_v8 = vld [vmem:[%s8806_s3 + $0xc] ss:$76 sps:$4 sm:$0xff]  }
   0x3   :  { %53 = vmatpush1.msra.mxu1 %v22_v1  ;;  %v5793_v6 = vld [vmem:[%s8806_s3 + $0x4] ss:$76 sps:$4 sm:$0xff]   ;;  %v5795_v7 = vld [vmem:[%s8806_s3 + $0x8] ss:$76 sps:$4 sm:$0xff]   ;;  %v5798_v9 = vld [vmem:[%s8806_s3] ss:$76 sps:$4 sm:$0xff]  }
   0x4   :  { %5064 = vmatmul.mubr.msk.f32.vlgmr.msra.gmra.mrb[0].mxu1 %vm48_vm0, %v21_v3  ;;  %123 = vmatprep.subr.mxu1 %v25_v4  ;;  %v5799_v10 = vld [vmem:[%s8806_s3 + $0x9c] ss:$76 sps:$4 sm:$0xff]   ;;  %v5803_v11 = vld [vmem:[%s8806_s3 + $0xa4] ss:$76 sps:$4 sm:$0xff]   ;;  %v5805_v13 = vld [vmem:[%s8806_s3 + $0x134] ss:$76 sps:$4 sm:$0xff]  }
   0x5   :  { %124 = vmatpush1.msra.mxu1 %v24_v5  ;;  %187 = vmatprep.mubr.f32.mxu1 %v6765_v2  ;;  %v5804_v12 = vld [vmem:[%s8806_s3 + $0x98] ss:$76 sps:$4 sm:$0xff]   ;;  %v5801_v14 = vld [vmem:[%s8806_s3 + $0xa0] ss:$76 sps:$4 sm:$0xff]   ;;  %v5809_v15 = vld [vmem:[%s8806_s3 + $0x13c] ss:$76 sps:$4 sm:$0xff]  }
   0x6   :  { %4015 = vmatprep.subr.bf16.mxu0 %v5793_v6  ;;  %4097 = vmatprep.subr.bf16.mxu1 %v5797_v8  ;;  %v5810_v16 = vld [vmem:[%s8806_s3 + $0x130] ss:$76 sps:$4 sm:$0xff]   ;;  %v5811_v17 = vld [vmem:[%s8806_s3 + $0x1cc] ss:$76 sps:$4 sm:$0xff]   ;;  %v5815_v19 = vld [vmem:[%s8806_s3 + $0x1d4] ss:$76 sps:$4 sm:$0xff]   ;;  %v28_v8 = vlaneseq }
   0x7   :  { %4016 = vmatpush1.bf16.msra.mxu0 %v5798_v9  ;;  %v5807_v18 = vld [vmem:[%s8806_s3 + $0x138] ss:$76 sps:$4 sm:$0xff]   ;;  %v5816_v20 = vld [vmem:[%s8806_s3 + $0x1c8] ss:$76 sps:$4 sm:$0xff]   ;;  %v5813_v22 = vld [vmem:[%s8806_s3 + $0x1d0] ss:$76 sps:$4 sm:$0xff]  }
   0x8   :  { %5065 = vmatmul.mubr.msk.f32.vlgmr.msra.gmra.mrb[2].mxu1 %vm48_vm0, %v21_v3  ;;  %4017 = vmatprep.subr.bf16.mxu0 %v5799_v10  ;;  %v5817_v21 = vld [vmem:[%s8806_s3 + $0x264] ss:$76 sps:$4 sm:$0xff]   ;;  %v5821_v23 = vld [vmem:[%s8806_s3 + $0x26c] ss:$76 sps:$4 sm:$0xff]   ;;  %v5823_v25 = vld [vmem:[%s8806_s3 + $0x2fc] ss:$76 sps:$4 sm:$0xff]  }
   0x9   :  { %4098 = vmatpush1.bf16.msra.mxu1 %v5795_v7  ;;  %v5822_v24 = vld [vmem:[%s8806_s3 + $0x260] ss:$76 sps:$4 sm:$0xff]   ;;  %v5819_v26 = vld [vmem:[%s8806_s3 + $0x268] ss:$76 sps:$4 sm:$0xff]   ;;  %v5827_v27 = vld [vmem:[%s8806_s3 + $0x304] ss:$76 sps:$4 sm:$0xff]  }
   0xa   :  { %4099 = vmatprep.subr.bf16.mxu1 %v5803_v11  ;;  %v5828_v28 = vld [vmem:[%s8806_s3 + $0x2f8] ss:$76 sps:$4 sm:$0xff]   ;;  %v5829_v29 = vld [vmem:[%s8806_s3 + $0x394] ss:$76 sps:$4 sm:$0xff]   ;;  %v5833_v31 = vld [vmem:[%s8806_s3 + $0x39c] ss:$76 sps:$4 sm:$0xff]  }
   0xb   :  { %4018 = vmatpush1.bf16.msra.mxu0 %v5804_v12  ;;  %v5825_v30 = vld [vmem:[%s8806_s3 + $0x300] ss:$76 sps:$4 sm:$0xff]   ;;  %v5834_v32 = vld [vmem:[%s8806_s3 + $0x390] ss:$76 sps:$4 sm:$0xff]   ;;  %v5831_v34 = vld [vmem:[%s8806_s3 + $0x398] ss:$76 sps:$4 sm:$0xff]  }
   0xc   :  { %4019 = vmatprep.subr.bf16.mxu0 %v5805_v13  ;;  %v5835_v33 = vld [vmem:[%s8806_s3 + $0x42c] ss:$76 sps:$4 sm:$0xff]   ;;  %v5839_v35 = vld [vmem:[%s8806_s3 + $0x434] ss:$76 sps:$4 sm:$0xff]   ;;  %v5841_v37 = vld [vmem:[%s8806_s3 + $0x4c4] ss:$76 sps:$4 sm:$0xff]  }
   0xd   :  { %4100 = vmatpush1.bf16.msra.mxu1 %v5801_v14  ;;  %v5840_v36 = vld [vmem:[%s8806_s3 + $0x428] ss:$76 sps:$4 sm:$0xff]   ;;  %v5837_v38 = vld [vmem:[%s8806_s3 + $0x430] ss:$76 sps:$4 sm:$0xff]   ;;  %v5845_v39 = vld [vmem:[%s8806_s3 + $0x4cc] ss:$76 sps:$4 sm:$0xff]  }
   0xe   :  { %4101 = vmatprep.subr.bf16.mxu1 %v5809_v15  ;;  %v5846_v40 = vld [vmem:[%s8806_s3 + $0x4c0] ss:$76 sps:$4 sm:$0xff]   ;;  %v5847_v41 = vld [vmem:[%s8806_s3 + $0x55c] ss:$76 sps:$4 sm:$0xff]   ;;  %v5851_v43 = vld [vmem:[%s8806_s3 + $0x564] ss:$76 sps:$4 sm:$0xff]  }
   0xf   :  { %4020 = vmatpush1.bf16.msra.mxu0 %v5810_v16  ;;  %v5843_v42 = vld [vmem:[%s8806_s3 + $0x4c8] ss:$76 sps:$4 sm:$0xff]   ;;  %v5849_v44 = vld [vmem:[%s8806_s3 + $0x560] ss:$76 sps:$4 sm:$0xff]   ;;  %v5852_v45 = vld [vmem:[%s8806_s3 + $0x558] ss:$76 sps:$4 sm:$0xff]  }
  0x10   :  { %4021 = vmatprep.subr.bf16.mxu0 %v5811_v17  ;;  %v5853_v46 = vld [vmem:[%s8806_s3 + $0x5f4] ss:$76 sps:$4 sm:$0xff]   ;;  %v5857_v47 = vld [vmem:[%s8806_s3 + $0x5fc] ss:$76 sps:$4 sm:$0xff]   ;;  %v5859_v49 = vld [vmem:[%s8806_s3 + $0x68c] ss:$76 sps:$4 sm:$0xff]  }
  0x11   :  { %4102 = vmatpush1.bf16.msra.mxu1 %v5807_v18  ;;  %v5858_v48 = vld [vmem:[%s8806_s3 + $0x5f0] ss:$76 sps:$4 sm:$0xff]   ;;  %v5855_v50 = vld [vmem:[%s8806_s3 + $0x5f8] ss:$76 sps:$4 sm:$0xff]   ;;  %v5863_v51 = vld [vmem:[%s8806_s3 + $0x694] ss:$76 sps:$4 sm:$0xff]  }
  0x12   :  { %4103 = vmatprep.subr.bf16.mxu1 %v5815_v19  ;;  %v5864_v52 = vld [vmem:[%s8806_s3 + $0x688] ss:$76 sps:$4 sm:$0xff]   ;;  %v5865_v53 = vld [vmem:[%s8806_s3 + $0x724] ss:$76 sps:$4 sm:$0xff]   ;;  %v5869_v55 = vld [vmem:[%s8806_s3 + $0x72c] ss:$76 sps:$4 sm:$0xff]  }
  0x13   :  { %4022 = vmatpush1.bf16.msra.mxu0 %v5816_v20  ;;  %v5861_v54 = vld [vmem:[%s8806_s3 + $0x690] ss:$76 sps:$4 sm:$0xff]   ;;  %v5870_v56 = vld [vmem:[%s8806_s3 + $0x720] ss:$76 sps:$4 sm:$0xff]   ;;  %v5867_v58 = vld [vmem:[%s8806_s3 + $0x728] ss:$76 sps:$4 sm:$0xff]  }
  0x14   :  { %4023 = vmatprep.subr.bf16.mxu0 %v5817_v21  ;;  %v5871_v57 = vld [vmem:[%s8806_s3 + $0x7bc] ss:$76 sps:$4 sm:$0xff]   ;;  %v5875_v59 = vld [vmem:[%s8806_s3 + $0x7c4] ss:$76 sps:$4 sm:$0xff]   ;;  %v5873_v61 = vld [vmem:[%s8806_s3 + $0x7c0] ss:$76 sps:$4 sm:$0xff]  }
  0x15   :  { %4104 = vmatpush1.bf16.msra.mxu1 %v5813_v22  ;;  %v5876_v60 = vld [vmem:[%s8806_s3 + $0x7b8] ss:$76 sps:$4 sm:$0xff]   ;;  %v5877_v62 = vld [vmem:[%s8806_s3 + $0x854] ss:$76 sps:$4 sm:$0xff]   ;;  %v5881_v63 = vld [vmem:[%s8806_s3 + $0x85c] ss:$76 sps:$4 sm:$0xff]  }
  0x16   :  { %4105 = vmatprep.subr.bf16.mxu1 %v5821_v23  ;;  %v5879_v0 = vld [vmem:[%s8806_s3 + $0x858] ss:$76 sps:$4 sm:$0xff]   ;;  %v5882_v1 = vld [vmem:[%s8806_s3 + $0x850] ss:$76 sps:$4 sm:$0xff]   ;;  %v5887_v3 = vld [vmem:[%s8806_s3 + $0x8f4] ss:$76 sps:$4 sm:$0xff]  }
  0x17   :  { %4024 = vmatpush1.bf16.msra.mxu0 %v5822_v24  ;;  %v5883_v2 = vld [vmem:[%s8806_s3 + $0x8ec] ss:$76 sps:$4 sm:$0xff]   ;;  %v5885_v4 = vld [vmem:[%s8806_s3 + $0x8f0] ss:$76 sps:$4 sm:$0xff]   ;;  %v5888_v5 = vld [vmem:[%s8806_s3 + $0x8e8] ss:$76 sps:$4 sm:$0xff]  }
  0x18   :  { %4025 = vmatprep.subr.bf16.mxu0 %v5823_v25  ;;  %v5891_v6 = vld [vmem:[%s8806_s3 + $0x984] ss:$76 sps:$4 sm:$0xff]   ;;  %v5894_v7 = vld [vmem:[%s8806_s3 + $0x98c] ss:$76 sps:$4 sm:$0xff]   ;;  %v7012_v9 = vshrl.u32 %v28_v8, 7 }
  0x19   :  { %4106 = vmatpush1.bf16.msra.mxu1 %v5819_v26  ;;  %v7017_v10 = vld [vmem:[%s8807_s2] sm:$0xf]  ;;  %v5892_v24 = vld [vmem:[%s8806_s3 + $0x988] ss:$76 sps:$4 sm:$0xff]   ;;  %v5957_v8 = vld [vmem:[%s8806_s3 + $0x100c] ss:$76 sps:$4 sm:$0xff]  }
  0x1a   :  { %4107 = vmatprep.subr.bf16.mxu1 %v5827_v27  ;;  %v7020_v11 = vsub.s32 0, %v7012_v9  ;;  %v7023_v12 = vsub.s32 1, %v7012_v9  ;;  %v7030_v15 = vsub.s32 3, %v7012_v9  ;;  %v5889_v23 = vld [vmem:[%s8806_s3 + $0x980] ss:$76 sps:$4 sm:$0xff]  }
  0x1b   :  { %4026 = vmatpush1.bf16.msra.mxu0 %v5828_v28  ;;  %v5897_v26 = vld [vmem:[%s8806_s3 + $0xa1c] ss:$76 sps:$4 sm:$0xff]   ;;  %v5900_v27 = vld [vmem:[%s8806_s3 + $0xa24] ss:$76 sps:$4 sm:$0xff]  }
  0x1c   :  { %4027 = vmatprep.subr.bf16.mxu0 %v5829_v29  ;;  %v31_v13 = vrot.slane %v7017_v10, %v7020_v11  ;;  %v35_v14 = vrot.slane %v7017_v10, %v7023_v12  ;;  %v43_v20 = vrot.slane %v7017_v10, %v7030_v15 }
  0x1d   :  { %4108 = vmatpush1.bf16.msra.mxu1 %v5825_v30 }
  0x1e   :  { %4109 = vmatprep.subr.bf16.mxu1 %v5833_v31 }
  0x1f   :  { %4028 = vmatpush1.bf16.msra.mxu0 %v5834_v32  ;;  %v5895_v32 = vld [vmem:[%s8806_s3 + $0xa18] ss:$76 sps:$4 sm:$0xff]  }
  0x20   :  { %4029 = vmatprep.subr.bf16.mxu0 %v5835_v33  ;;  %v5898_v33 = vld [vmem:[%s8806_s3 + $0xa20] ss:$76 sps:$4 sm:$0xff]  }
  0x21   :  { %4110 = vmatpush1.bf16.msra.mxu1 %v5831_v34 }
  0x22   :  { %4111 = vmatprep.subr.bf16.mxu1 %v5839_v35  ;;  %v5903_v35 = vld [vmem:[%s8806_s3 + $0xab4] ss:$76 sps:$4 sm:$0xff]  }
  0x23   :  { %4030 = vmatpush1.bf16.msra.mxu0 %v5840_v36  ;;  %v5906_v36 = vld [vmem:[%s8806_s3 + $0xabc] ss:$76 sps:$4 sm:$0xff]  }
  0x24   :  { %4031 = vmatprep.subr.bf16.mxu0 %v5841_v37 }
  0x25   :  { %4112 = vmatpush1.bf16.msra.mxu1 %v5837_v38  ;;  %v5901_v38 = vld [vmem:[%s8806_s3 + $0xab0] ss:$76 sps:$4 sm:$0xff]  }
  0x26   :  { %4113 = vmatprep.subr.bf16.mxu1 %v5845_v39  ;;  %v5904_v39 = vld [vmem:[%s8806_s3 + $0xab8] ss:$76 sps:$4 sm:$0xff]  }
  0x27   :  { %4032 = vmatpush1.bf16.msra.mxu0 %v5846_v40  ;;  %v5909_v40 = vld [vmem:[%s8806_s3 + $0xb4c] ss:$76 sps:$4 sm:$0xff]  }
  0x28   :  { %4033 = vmatprep.subr.bf16.mxu0 %v5847_v41  ;;  %v5912_v41 = vld [vmem:[%s8806_s3 + $0xb54] ss:$76 sps:$4 sm:$0xff]  }
  0x29   :  { %4114 = vmatpush1.bf16.msra.mxu1 %v5843_v42  ;;  %v5907_v42 = vld [vmem:[%s8806_s3 + $0xb48] ss:$76 sps:$4 sm:$0xff]  }
  0x2a   :  { %4115 = vmatprep.subr.bf16.mxu1 %v5851_v43  ;;  %v5910_v43 = vld [vmem:[%s8806_s3 + $0xb50] ss:$76 sps:$4 sm:$0xff]  }
  0x2b   :  { %4034 = vmatpush1.bf16.msra.mxu0 %v5852_v45  ;;  %v5918_v45 = vld [vmem:[%s8806_s3 + $0xbec] ss:$76 sps:$4 sm:$0xff]  }
  0x2c   :  { %4035 = vmatprep.subr.bf16.mxu0 %v5853_v46  ;;  %v5913_v46 = vld [vmem:[%s8806_s3 + $0xbe0] ss:$76 sps:$4 sm:$0xff]  }
  0x2d   :  { %4116 = vmatpush1.bf16.msra.mxu1 %v5849_v44  ;;  %v5915_v44 = vld [vmem:[%s8806_s3 + $0xbe4] ss:$76 sps:$4 sm:$0xff]  }
  0x2e   :  { %4117 = vmatprep.subr.bf16.mxu1 %v5857_v47  ;;  %v5916_v47 = vld [vmem:[%s8806_s3 + $0xbe8] ss:$76 sps:$4 sm:$0xff]  }
  0x2f   :  { %4036 = vmatpush1.bf16.msra.mxu0 %v5858_v48  ;;  %v5921_v48 = vld [vmem:[%s8806_s3 + $0xc7c] ss:$76 sps:$4 sm:$0xff]  }
  0x30   :  { %4037 = vmatprep.subr.bf16.mxu0 %v5859_v49  ;;  %v5924_v49 = vld [vmem:[%s8806_s3 + $0xc84] ss:$76 sps:$4 sm:$0xff]  }
  0x31   :  { %4118 = vmatpush1.bf16.msra.mxu1 %v5855_v50  ;;  %v5919_v50 = vld [vmem:[%s8806_s3 + $0xc78] ss:$76 sps:$4 sm:$0xff]  }
  0x32   :  { %4119 = vmatprep.subr.bf16.mxu1 %v5863_v51  ;;  %v5922_v51 = vld [vmem:[%s8806_s3 + $0xc80] ss:$76 sps:$4 sm:$0xff]  }
  0x33   :  { %4038 = vmatpush1.bf16.msra.mxu0 %v5864_v52  ;;  %v5927_v52 = vld [vmem:[%s8806_s3 + $0xd14] ss:$76 sps:$4 sm:$0xff]  }
  0x34   :  { %4039 = vmatprep.subr.bf16.mxu0 %v5865_v53  ;;  %v5930_v53 = vld [vmem:[%s8806_s3 + $0xd1c] ss:$76 sps:$4 sm:$0xff]  }
  0x35   :  { %4120 = vmatpush1.bf16.msra.mxu1 %v5861_v54  ;;  %v5925_v54 = vld [vmem:[%s8806_s3 + $0xd10] ss:$76 sps:$4 sm:$0xff]  }
  0x36   :  { %4121 = vmatprep.subr.bf16.mxu1 %v5869_v55  ;;  %v5928_v55 = vld [vmem:[%s8806_s3 + $0xd18] ss:$76 sps:$4 sm:$0xff]  }
  0x37   :  { %4040 = vmatpush1.bf16.msra.mxu0 %v5870_v56  ;;  %v5933_v56 = vld [vmem:[%s8806_s3 + $0xdac] ss:$76 sps:$4 sm:$0xff]  }
  0x38   :  { %4041 = vmatprep.subr.bf16.mxu0 %v5871_v57  ;;  %v5936_v57 = vld [vmem:[%s8806_s3 + $0xdb4] ss:$76 sps:$4 sm:$0xff]  }
  0x39   :  { %4122 = vmatpush1.bf16.msra.mxu1 %v5867_v58  ;;  %v5931_v58 = vld [vmem:[%s8806_s3 + $0xda8] ss:$76 sps:$4 sm:$0xff]  }
  0x3a   :  { %4123 = vmatprep.subr.bf16.mxu1 %v5875_v59  ;;  %v5934_v59 = vld [vmem:[%s8806_s3 + $0xdb0] ss:$76 sps:$4 sm:$0xff]  }
  0x3b   :  { %4042 = vmatpush1.bf16.msra.mxu0 %v5876_v60  ;;  %v5939_v60 = vld [vmem:[%s8806_s3 + $0xe44] ss:$76 sps:$4 sm:$0xff]  }
  0x3c   :  { %4043 = vmatprep.subr.bf16.mxu0 %v5877_v62  ;;  %v5937_v62 = vld [vmem:[%s8806_s3 + $0xe40] ss:$76 sps:$4 sm:$0xff]  }
  0x3d   :  { %4124 = vmatpush1.bf16.msra.mxu1 %v5873_v61  ;;  %v5942_v61 = vld [vmem:[%s8806_s3 + $0xe4c] ss:$76 sps:$4 sm:$0xff]  }
  0x3e   :  { %4125 = vmatprep.subr.bf16.mxu1 %v5881_v63  ;;  %v5940_v63 = vld [vmem:[%s8806_s3 + $0xe48] ss:$76 sps:$4 sm:$0xff]  }
  0x3f   :  { %4044 = vmatpush1.bf16.msra.mxu0 %v5882_v1  ;;  %v5948_v1 = vld [vmem:[%s8806_s3 + $0xee4] ss:$76 sps:$4 sm:$0xff]  }
  0x40   :  { %4045 = vmatprep.subr.bf16.mxu0 %v5883_v2  ;;  %v5943_v2 = vld [vmem:[%s8806_s3 + $0xed8] ss:$76 sps:$4 sm:$0xff]  }
  0x41   :  { %4126 = vmatpush1.bf16.msra.mxu1 %v5879_v0  ;;  %v5945_v0 = vld [vmem:[%s8806_s3 + $0xedc] ss:$76 sps:$4 sm:$0xff]  }
  0x42   :  { %4127 = vmatprep.subr.bf16.mxu1 %v5887_v3  ;;  %v5946_v3 = vld [vmem:[%s8806_s3 + $0xee0] ss:$76 sps:$4 sm:$0xff]  }
  0x43   :  { %4046 = vmatpush1.bf16.msra.mxu0 %v5888_v5  ;;  %v5954_v5 = vld [vmem:[%s8806_s3 + $0xf7c] ss:$76 sps:$4 sm:$0xff]  }
  0x44   :  { %4056 = vmatprep.subr.bf16.mxu0 %v5891_v6  ;;  %v5949_v6 = vld [vmem:[%s8806_s3 + $0xf70] ss:$76 sps:$4 sm:$0xff]  }
  0x45   :  { %4128 = vmatpush1.bf16.msra.mxu1 %v5885_v4  ;;  %v5951_v4 = vld [vmem:[%s8806_s3 + $0xf74] ss:$76 sps:$4 sm:$0xff]  }
  0x46   :  { %4138 = vmatprep.subr.bf16.mxu1 %v5894_v7  ;;  %v5952_v7 = vld [vmem:[%s8806_s3 + $0xf78] ss:$76 sps:$4 sm:$0xff]  }
  0xd7   :  { %v118_v16 = vpop.f32.mrb[0].mxu1 }
  0xd8   :  { %v119_v17 = vadd.f32 %v118_v16, %v31_v13  ;;  %v120_v18 = vpop.f32.mrb[1].mxu1  ;;  %v5960_v13 = vld [vmem:[%s8806_s3 + $0x1014] ss:$76 sps:$4 sm:$0xff]   ;;  %v5958_v16 = vld [vmem:[%s8806_s3 + $0x1010] ss:$76 sps:$4 sm:$0xff]  }
  0xd9   :  { %v121_v19 = vadd.f32 %v120_v18, %v35_v14  ;;  %v5955_v14 = vld [vmem:[%s8806_s3 + $0x1008] ss:$76 sps:$4 sm:$0xff]   ;;  %v5966_v18 = vld [vmem:[%s8806_s3 + $0x10ac] ss:$76 sps:$4 sm:$0xff]  }
  0xda   :  { %v194_v21 = vmax.f32 %v119_v17, 0.0  ;;  %v5963_v17 = vld [vmem:[%s8806_s3 + $0x10a4] ss:$76 sps:$4 sm:$0xff]  }
  0xdb   :  { %v195_v22 = vmax.f32 %v121_v19, 0.0  ;;  %v7040_v25 = vpop.f32.mrb[2].mxu1  ;;  %v5961_v19 = vld [vmem:[%s8806_s3 + $0x10a0] ss:$76 sps:$4 sm:$0xff]  }
  0xdc   :  { %v191_v28 = vpop.f32.mrb[3].mxu1  ;;  %v7050_v31 = vpack.c.bf16 %v194_v21, %v194_v21  ;;  %v7199_v21 = vsub.s32 2, %v7012_v9 }
  0xdd   :  { %v7048_v29 = vpack.c.bf16 %v195_v22, %v195_v22  ;;  %v192_v30 = vadd.f32 %v191_v28, %v43_v20  ;;  %v5964_v20 = vld [vmem:[%s8806_s3 + $0x10a8] ss:$76 sps:$4 sm:$0xff]  }
  0xde   :  { %v5969_v22 = vld [vmem:[%s8806_s3 + $0x113c] ss:$76 sps:$4 sm:$0xff]   ;;  %v5975_v28 = vld [vmem:[%s8806_s3 + $0x11d4] ss:$76 sps:$4 sm:$0xff]  }
  0xdf   :  { %4047 = vmatprep.mubr.bf16.mxu0 %v7048_v29  ;;  %4129 = vmatprep.mubr.bf16.mxu1 %v7048_v29  ;;  %v197_v34 = vmax.f32 %v192_v30, 0.0  ;;  %v5978_v30 = vld [vmem:[%s8806_s3 + $0x11dc] ss:$76 sps:$4 sm:$0xff]  }
  0xe0   :  { %4048 = vmatmul.mubr.bf16.vlgmr.msra.gmra.mrb[0].mxu0 %v7050_v31  ;;  %4130 = vmatmul.mubr.bf16.vlgmr.msra.gmra.mrb[4].mxu1 %v7050_v31 }
  0xe1   :  { %4057 = vmatpush1.bf16.msra.mxu0 %v5889_v23  ;;  %4139 = vmatpush1.bf16.msra.mxu1 %v5892_v24  ;;  %v7068_v37 = vpack.c.bf16 %v197_v34, %v197_v34  ;;  %v5972_v23 = vld [vmem:[%s8806_s3 + $0x1144] ss:$76 sps:$4 sm:$0xff]   ;;  %v5981_v34 = vld [vmem:[%s8806_s3 + $0x126c] ss:$76 sps:$4 sm:$0xff]  }
  0xe2   :  { %4058 = vmatprep.subr.bf16.mxu0 %v5897_v26  ;;  %4140 = vmatprep.subr.bf16.mxu1 %v5900_v27  ;;  %v5967_v24 = vld [vmem:[%s8806_s3 + $0x1138] ss:$76 sps:$4 sm:$0xff]   ;;  %v5970_v26 = vld [vmem:[%s8806_s3 + $0x1140] ss:$76 sps:$4 sm:$0xff]   ;;  %v39_v27 = vrot.slane %v7017_v10, %v7199_v21 }
  0xe3   :  { %4088 = vmatprep.mubr.bf16.mxu0 %v7068_v37  ;;  %4170 = vmatprep.mubr.bf16.mxu1 %v7068_v37  ;;  %v5976_v10 = vld [vmem:[%s8806_s3 + $0x11d8] ss:$76 sps:$4 sm:$0xff]  }
  0xe5   :  { %4059 = vmatpush1.bf16.msra.mxu0 %v5895_v32  ;;  %4141 = vmatpush1.bf16.msra.mxu1 %v5898_v33  ;;  %v5973_v32 = vld [vmem:[%s8806_s3 + $0x11d0] ss:$76 sps:$4 sm:$0xff]   ;;  %v190_v33 = vadd.f32 %v7040_v25, %v39_v27 }
  0xe6   :  { %4060 = vmatprep.subr.bf16.mxu0 %v5903_v35  ;;  %4142 = vmatprep.subr.bf16.mxu1 %v5906_v36  ;;  %v5984_v35 = vld [vmem:[%s8806_s3 + $0x1274] ss:$76 sps:$4 sm:$0xff]   ;;  %v5982_v25 = vld [vmem:[%s8806_s3 + $0x1270] ss:$76 sps:$4 sm:$0xff]  }
  0xe7   :  { %v5979_v36 = vld [vmem:[%s8806_s3 + $0x1268] ss:$76 sps:$4 sm:$0xff]  }
  0xe8   :  { %v6053_v27 = vld [vmem:[%s8806_s3 + $0x69c] ss:$76 sps:$4 sm:$0xff]  }
  0xe9   :  { %4061 = vmatpush1.bf16.msra.mxu0 %v5901_v38  ;;  %4143 = vmatpush1.bf16.msra.mxu1 %v5904_v39  ;;  %v196_v38 = vmax.f32 %v190_v33, 0.0  ;;  %v5987_v39 = vld [vmem:[%s8806_s3 + $0x14] ss:$76 sps:$4 sm:$0xff]   ;;  %v6062_v33 = vld [vmem:[%s8806_s3 + $0x73c] ss:$76 sps:$4 sm:$0xff]  }
  0xea   :  { %4062 = vmatprep.subr.bf16.mxu0 %v5909_v40  ;;  %4144 = vmatprep.subr.bf16.mxu1 %v5912_v41  ;;  %v5990_v40 = vld [vmem:[%s8806_s3 + $0x1c] ss:$76 sps:$4 sm:$0xff]  }
  0xeb   :  { %v5985_v41 = vld [vmem:[%s8806_s3 + $0x10] ss:$76 sps:$4 sm:$0xff]  }
  0xed   :  { %4063 = vmatpush1.bf16.msra.mxu0 %v5907_v42  ;;  %4145 = vmatpush1.bf16.msra.mxu1 %v5910_v43  ;;  %v7249_v42 = vpack.c.bf16 %v196_v38, %v196_v38  ;;  %v5988_v43 = vld [vmem:[%s8806_s3 + $0x18] ss:$76 sps:$4 sm:$0xff]   ;;  %v6063_v38 = vld [vmem:[%s8806_s3 + $0x7c8] ss:$76 sps:$4 sm:$0xff]  }
  0xee   :  { %4064 = vmatprep.subr.bf16.mxu0 %v5915_v44  ;;  %4146 = vmatprep.subr.bf16.mxu1 %v5918_v45  ;;  %v5993_v44 = vld [vmem:[%s8806_s3 + $0xac] ss:$76 sps:$4 sm:$0xff]   ;;  %v5996_v45 = vld [vmem:[%s8806_s3 + $0xb4] ss:$76 sps:$4 sm:$0xff]  }
  0xf1   :  { %4065 = vmatpush1.bf16.msra.mxu0 %v5913_v46  ;;  %4147 = vmatpush1.bf16.msra.mxu1 %v5916_v47  ;;  %v5991_v46 = vld [vmem:[%s8806_s3 + $0xa8] ss:$76 sps:$4 sm:$0xff]   ;;  %v5994_v47 = vld [vmem:[%s8806_s3 + $0xb0] ss:$76 sps:$4 sm:$0xff]  }
  0xf2   :  { %4066 = vmatprep.subr.bf16.mxu0 %v5921_v48  ;;  %4148 = vmatprep.subr.bf16.mxu1 %v5924_v49  ;;  %v5999_v48 = vld [vmem:[%s8806_s3 + $0x144] ss:$76 sps:$4 sm:$0xff]   ;;  %v6002_v49 = vld [vmem:[%s8806_s3 + $0x14c] ss:$76 sps:$4 sm:$0xff]  }
  0xf5   :  { %4067 = vmatpush1.bf16.msra.mxu0 %v5919_v50  ;;  %4149 = vmatpush1.bf16.msra.mxu1 %v5922_v51  ;;  %v5997_v50 = vld [vmem:[%s8806_s3 + $0x140] ss:$76 sps:$4 sm:$0xff]   ;;  %v6000_v51 = vld [vmem:[%s8806_s3 + $0x148] ss:$76 sps:$4 sm:$0xff]  }
  0xf6   :  { %4068 = vmatprep.subr.bf16.mxu0 %v5927_v52  ;;  %4150 = vmatprep.subr.bf16.mxu1 %v5930_v53  ;;  %v6005_v52 = vld [vmem:[%s8806_s3 + $0x1dc] ss:$76 sps:$4 sm:$0xff]   ;;  %v6003_v53 = vld [vmem:[%s8806_s3 + $0x1d8] ss:$76 sps:$4 sm:$0xff]  }
  0xf9   :  { %4069 = vmatpush1.bf16.msra.mxu0 %v5925_v54  ;;  %4151 = vmatpush1.bf16.msra.mxu1 %v5928_v55  ;;  %v6008_v54 = vld [vmem:[%s8806_s3 + $0x1e4] ss:$76 sps:$4 sm:$0xff]   ;;  %v6006_v55 = vld [vmem:[%s8806_s3 + $0x1e0] ss:$76 sps:$4 sm:$0xff]  }
  0xfa   :  { %4070 = vmatprep.subr.bf16.mxu0 %v5933_v56  ;;  %4152 = vmatprep.subr.bf16.mxu1 %v5936_v57  ;;  %v6011_v56 = vld [vmem:[%s8806_s3 + $0x274] ss:$76 sps:$4 sm:$0xff]   ;;  %v6009_v57 = vld [vmem:[%s8806_s3 + $0x270] ss:$76 sps:$4 sm:$0xff]  }
  0xfd   :  { %4071 = vmatpush1.bf16.msra.mxu0 %v5931_v58  ;;  %4153 = vmatpush1.bf16.msra.mxu1 %v5934_v59  ;;  %v6014_v58 = vld [vmem:[%s8806_s3 + $0x27c] ss:$76 sps:$4 sm:$0xff]   ;;  %v6012_v59 = vld [vmem:[%s8806_s3 + $0x278] ss:$76 sps:$4 sm:$0xff]  }
  0xfe   :  { %4072 = vmatprep.subr.bf16.mxu0 %v5939_v60  ;;  %4154 = vmatprep.subr.bf16.mxu1 %v5942_v61  ;;  %v6017_v60 = vld [vmem:[%s8806_s3 + $0x30c] ss:$76 sps:$4 sm:$0xff]   ;;  %v6015_v61 = vld [vmem:[%s8806_s3 + $0x308] ss:$76 sps:$4 sm:$0xff]  }
 0x101   :  { %4073 = vmatpush1.bf16.msra.mxu0 %v5937_v62  ;;  %4155 = vmatpush1.bf16.msra.mxu1 %v5940_v63  ;;  %v6020_v62 = vld [vmem:[%s8806_s3 + $0x314] ss:$76 sps:$4 sm:$0xff]   ;;  %v6018_v63 = vld [vmem:[%s8806_s3 + $0x310] ss:$76 sps:$4 sm:$0xff]  }
 0x102   :  { %4074 = vmatprep.subr.bf16.mxu0 %v5945_v0  ;;  %4156 = vmatprep.subr.bf16.mxu1 %v5948_v1  ;;  %v6023_v0 = vld [vmem:[%s8806_s3 + $0x3a4] ss:$76 sps:$4 sm:$0xff]   ;;  %v6021_v1 = vld [vmem:[%s8806_s3 + $0x3a0] ss:$76 sps:$4 sm:$0xff]  }
 0x105   :  { %4075 = vmatpush1.bf16.msra.mxu0 %v5943_v2  ;;  %4157 = vmatpush1.bf16.msra.mxu1 %v5946_v3  ;;  %v6026_v2 = vld [vmem:[%s8806_s3 + $0x3ac] ss:$76 sps:$4 sm:$0xff]   ;;  %v6024_v3 = vld [vmem:[%s8806_s3 + $0x3a8] ss:$76 sps:$4 sm:$0xff]  }
 0x106   :  { %4076 = vmatprep.subr.bf16.mxu0 %v5951_v4  ;;  %4158 = vmatprep.subr.bf16.mxu1 %v5954_v5  ;;  %v6029_v4 = vld [vmem:[%s8806_s3 + $0x43c] ss:$76 sps:$4 sm:$0xff]   ;;  %v6032_v5 = vld [vmem:[%s8806_s3 + $0x444] ss:$76 sps:$4 sm:$0xff]  }
 0x109   :  { %4077 = vmatpush1.bf16.msra.mxu0 %v5949_v6  ;;  %4159 = vmatpush1.bf16.msra.mxu1 %v5952_v7  ;;  %v6027_v6 = vld [vmem:[%s8806_s3 + $0x438] ss:$76 sps:$4 sm:$0xff]   ;;  %v6030_v7 = vld [vmem:[%s8806_s3 + $0x440] ss:$76 sps:$4 sm:$0xff]  }
 0x10a   :  { %4078 = vmatprep.subr.bf16.mxu0 %v5957_v8  ;;  %4160 = vmatprep.subr.bf16.mxu1 %v5960_v13  ;;  %v6035_v8 = vld [vmem:[%s8806_s3 + $0x4d4] ss:$76 sps:$4 sm:$0xff]   ;;  %v6038_v13 = vld [vmem:[%s8806_s3 + $0x4dc] ss:$76 sps:$4 sm:$0xff]  }
 0x10d   :  { %4079 = vmatpush1.bf16.msra.mxu0 %v5955_v14  ;;  %4161 = vmatpush1.bf16.msra.mxu1 %v5958_v16  ;;  %v6033_v14 = vld [vmem:[%s8806_s3 + $0x4d0] ss:$76 sps:$4 sm:$0xff]   ;;  %v6036_v16 = vld [vmem:[%s8806_s3 + $0x4d8] ss:$76 sps:$4 sm:$0xff]  }
 0x10e   :  { %4080 = vmatprep.subr.bf16.mxu0 %v5963_v17  ;;  %4162 = vmatprep.subr.bf16.mxu1 %v5966_v18  ;;  %v6041_v17 = vld [vmem:[%s8806_s3 + $0x56c] ss:$76 sps:$4 sm:$0xff]   ;;  %v6044_v18 = vld [vmem:[%s8806_s3 + $0x574] ss:$76 sps:$4 sm:$0xff]  }
 0x111   :  { %4081 = vmatpush1.bf16.msra.mxu0 %v5961_v19  ;;  %4163 = vmatpush1.bf16.msra.mxu1 %v5964_v20  ;;  %v6039_v19 = vld [vmem:[%s8806_s3 + $0x568] ss:$76 sps:$4 sm:$0xff]   ;;  %v6042_v20 = vld [vmem:[%s8806_s3 + $0x570] ss:$76 sps:$4 sm:$0xff]  }
 0x112   :  { %4082 = vmatprep.subr.bf16.mxu0 %v5969_v22  ;;  %4164 = vmatprep.subr.bf16.mxu1 %v5972_v23  ;;  %v6047_v22 = vld [vmem:[%s8806_s3 + $0x604] ss:$76 sps:$4 sm:$0xff]   ;;  %v6050_v23 = vld [vmem:[%s8806_s3 + $0x60c] ss:$76 sps:$4 sm:$0xff]  }
 0x115   :  { %4083 = vmatpush1.bf16.msra.mxu0 %v5967_v24  ;;  %4165 = vmatpush1.bf16.msra.mxu1 %v5970_v26  ;;  %v6045_v24 = vld [vmem:[%s8806_s3 + $0x600] ss:$76 sps:$4 sm:$0xff]   ;;  %v6048_v26 = vld [vmem:[%s8806_s3 + $0x608] ss:$76 sps:$4 sm:$0xff]  }
 0x116   :  { %4084 = vmatprep.subr.bf16.mxu0 %v5975_v28  ;;  %4166 = vmatprep.subr.bf16.mxu1 %v5978_v30  ;;  %v6056_v28 = vld [vmem:[%s8806_s3 + $0x6a4] ss:$76 sps:$4 sm:$0xff]  }
 0x117   :  { %v6051_v30 = vld [vmem:[%s8806_s3 + $0x698] ss:$76 sps:$4 sm:$0xff]  }
 0x119   :  { %4085 = vmatpush1.bf16.msra.mxu0 %v5973_v32  ;;  %4167 = vmatpush1.bf16.msra.mxu1 %v5976_v10  ;;  %v6054_v32 = vld [vmem:[%s8806_s3 + $0x6a0] ss:$76 sps:$4 sm:$0xff]  }
 0x11a   :  { %4086 = vmatprep.subr.bf16.mxu0 %v5981_v34  ;;  %4168 = vmatprep.subr.bf16.mxu1 %v5984_v35  ;;  %v6059_v10 = vld [vmem:[%s8806_s3 + $0x734] ss:$76 sps:$4 sm:$0xff]   ;;  %v6057_v34 = vld [vmem:[%s8806_s3 + $0x730] ss:$76 sps:$4 sm:$0xff]   ;;  %v6060_v35 = vld [vmem:[%s8806_s3 + $0x738] ss:$76 sps:$4 sm:$0xff]  }
 0x11d   :  { %4087 = vmatpush1.bf16.msra.mxu0 %v5979_v36  ;;  %4169 = vmatpush1.bf16.msra.mxu1 %v5982_v25  ;;  %v6065_v36 = vld [vmem:[%s8806_s3 + $0x7cc] ss:$76 sps:$4 sm:$0xff]   ;;  %v6068_v25 = vld [vmem:[%s8806_s3 + $0x7d4] ss:$76 sps:$4 sm:$0xff]  }
 0x11e   :  { %4179 = vmatprep.subr.bf16.mxu0 %v5987_v39  ;;  %4261 = vmatprep.subr.bf16.mxu1 %v5990_v40  ;;  %v6066_v39 = vld [vmem:[%s8806_s3 + $0x7d0] ss:$76 sps:$4 sm:$0xff]  }
 0x11f   :  { %v6071_v40 = vld [vmem:[%s8806_s3 + $0x864] ss:$76 sps:$4 sm:$0xff]  }
 0x120   :  { %4089 = vmatmul.mubr.bf16.vlgmr.msra.gmra.mrb[0].mxu0 %v7249_v42  ;;  %4171 = vmatmul.mubr.bf16.vlgmr.msra.gmra.mrb[4].mxu1 %v7249_v42 }
 0x121   :  { %4180 = vmatpush1.bf16.msra.mxu0 %v5985_v41  ;;  %4211 = vmatprep.mubr.bf16.mxu0 %v7048_v29  ;;  %v6074_v41 = vld [vmem:[%s8806_s3 + $0x86c] ss:$76 sps:$4 sm:$0xff]  }
 0x122   :  { %4262 = vmatpush1.bf16.msra.mxu1 %v5988_v43  ;;  %4293 = vmatprep.mubr.bf16.mxu1 %v7048_v29  ;;  %v6069_v43 = vld [vmem:[%s8806_s3 + $0x860] ss:$76 sps:$4 sm:$0xff]  }
 0x123   :  { %4181 = vmatprep.subr.bf16.mxu0 %v5993_v44  ;;  %4263 = vmatprep.subr.bf16.mxu1 %v5996_v45  ;;  %v6072_v44 = vld [vmem:[%s8806_s3 + $0x868] ss:$76 sps:$4 sm:$0xff]  }
 0x124   :  { %v6077_v45 = vld [vmem:[%s8806_s3 + $0x8fc] ss:$76 sps:$4 sm:$0xff]  }
 0x125   :  { %4182 = vmatpush1.bf16.msra.mxu0 %v5991_v46  ;;  %v6080_v46 = vld [vmem:[%s8806_s3 + $0x904] ss:$76 sps:$4 sm:$0xff]  }
 0x126   :  { %4264 = vmatpush1.bf16.msra.mxu1 %v5994_v47  ;;  %4183 = vmatprep.subr.bf16.mxu0 %v5999_v48  ;;  %v6075_v47 = vld [vmem:[%s8806_s3 + $0x8f8] ss:$76 sps:$4 sm:$0xff]   ;;  %v6078_v48 = vld [vmem:[%s8806_s3 + $0x900] ss:$76 sps:$4 sm:$0xff]  }
 0x127   :  { %4265 = vmatprep.subr.bf16.mxu1 %v6002_v49  ;;  %v6083_v49 = vld [vmem:[%s8806_s3 + $0x994] ss:$76 sps:$4 sm:$0xff]  }
 0x129   :  { %4184 = vmatpush1.bf16.msra.mxu0 %v5997_v50  ;;  %v6086_v50 = vld [vmem:[%s8806_s3 + $0x99c] ss:$76 sps:$4 sm:$0xff]  }
 0x12a   :  { %4266 = vmatpush1.bf16.msra.mxu1 %v6000_v51  ;;  %4185 = vmatprep.subr.bf16.mxu0 %v6005_v52  ;;  %v6081_v51 = vld [vmem:[%s8806_s3 + $0x990] ss:$76 sps:$4 sm:$0xff]   ;;  %v6084_v52 = vld [vmem:[%s8806_s3 + $0x998] ss:$76 sps:$4 sm:$0xff]  }
 0x12b   :  { %4267 = vmatprep.subr.bf16.mxu1 %v6008_v54  ;;  %v6092_v54 = vld [vmem:[%s8806_s3 + $0xa34] ss:$76 sps:$4 sm:$0xff]  }
 0x12d   :  { %4186 = vmatpush1.bf16.msra.mxu0 %v6003_v53  ;;  %v6089_v53 = vld [vmem:[%s8806_s3 + $0xa2c] ss:$76 sps:$4 sm:$0xff]  }
 0x12e   :  { %4268 = vmatpush1.bf16.msra.mxu1 %v6006_v55  ;;  %4187 = vmatprep.subr.bf16.mxu0 %v6011_v56  ;;  %v6087_v55 = vld [vmem:[%s8806_s3 + $0xa28] ss:$76 sps:$4 sm:$0xff]   ;;  %v6090_v56 = vld [vmem:[%s8806_s3 + $0xa30] ss:$76 sps:$4 sm:$0xff]  }
 0x12f   :  { %4269 = vmatprep.subr.bf16.mxu1 %v6014_v58  ;;  %v6098_v58 = vld [vmem:[%s8806_s3 + $0xacc] ss:$76 sps:$4 sm:$0xff]  }
 0x131   :  { %4188 = vmatpush1.bf16.msra.mxu0 %v6009_v57  ;;  %v6095_v57 = vld [vmem:[%s8806_s3 + $0xac4] ss:$76 sps:$4 sm:$0xff]  }
 0x132   :  { %4270 = vmatpush1.bf16.msra.mxu1 %v6012_v59  ;;  %4189 = vmatprep.subr.bf16.mxu0 %v6017_v60  ;;  %v6093_v59 = vld [vmem:[%s8806_s3 + $0xac0] ss:$76 sps:$4 sm:$0xff]   ;;  %v6096_v60 = vld [vmem:[%s8806_s3 + $0xac8] ss:$76 sps:$4 sm:$0xff]  }
 0x133   :  { %4271 = vmatprep.subr.bf16.mxu1 %v6020_v62  ;;  %v6104_v62 = vld [vmem:[%s8806_s3 + $0xb64] ss:$76 sps:$4 sm:$0xff]  }
 0x135   :  { %4190 = vmatpush1.bf16.msra.mxu0 %v6015_v61  ;;  %v6101_v61 = vld [vmem:[%s8806_s3 + $0xb5c] ss:$76 sps:$4 sm:$0xff]  }
 0x136   :  { %4272 = vmatpush1.bf16.msra.mxu1 %v6018_v63  ;;  %4191 = vmatprep.subr.bf16.mxu0 %v6023_v0  ;;  %v6099_v63 = vld [vmem:[%s8806_s3 + $0xb58] ss:$76 sps:$4 sm:$0xff]   ;;  %v6102_v0 = vld [vmem:[%s8806_s3 + $0xb60] ss:$76 sps:$4 sm:$0xff]  }
 0x137   :  { %4273 = vmatprep.subr.bf16.mxu1 %v6026_v2  ;;  %v6110_v2 = vld [vmem:[%s8806_s3 + $0xbfc] ss:$76 sps:$4 sm:$0xff]  }
 0x139   :  { %4192 = vmatpush1.bf16.msra.mxu0 %v6021_v1  ;;  %v6107_v1 = vld [vmem:[%s8806_s3 + $0xbf4] ss:$76 sps:$4 sm:$0xff]  }
 0x13a   :  { %4274 = vmatpush1.bf16.msra.mxu1 %v6024_v3  ;;  %4193 = vmatprep.subr.bf16.mxu0 %v6029_v4  ;;  %v6105_v3 = vld [vmem:[%s8806_s3 + $0xbf0] ss:$76 sps:$4 sm:$0xff]   ;;  %v6108_v4 = vld [vmem:[%s8806_s3 + $0xbf8] ss:$76 sps:$4 sm:$0xff]  }
 0x13b   :  { %4275 = vmatprep.subr.bf16.mxu1 %v6032_v5  ;;  %v6113_v5 = vld [vmem:[%s8806_s3 + $0xc8c] ss:$76 sps:$4 sm:$0xff]  }
 0x13d   :  { %4194 = vmatpush1.bf16.msra.mxu0 %v6027_v6  ;;  %v6116_v6 = vld [vmem:[%s8806_s3 + $0xc94] ss:$76 sps:$4 sm:$0xff]  }
 0x13e   :  { %4276 = vmatpush1.bf16.msra.mxu1 %v6030_v7  ;;  %4195 = vmatprep.subr.bf16.mxu0 %v6035_v8  ;;  %v6111_v7 = vld [vmem:[%s8806_s3 + $0xc88] ss:$76 sps:$4 sm:$0xff]   ;;  %v6114_v8 = vld [vmem:[%s8806_s3 + $0xc90] ss:$76 sps:$4 sm:$0xff]  }
 0x13f   :  { %4277 = vmatprep.subr.bf16.mxu1 %v6038_v13  ;;  %v6119_v13 = vld [vmem:[%s8806_s3 + $0xd24] ss:$76 sps:$4 sm:$0xff]  }
 0x141   :  { %4196 = vmatpush1.bf16.msra.mxu0 %v6033_v14  ;;  %v6122_v14 = vld [vmem:[%s8806_s3 + $0xd2c] ss:$76 sps:$4 sm:$0xff]  }
 0x142   :  { %4278 = vmatpush1.bf16.msra.mxu1 %v6036_v16  ;;  %4197 = vmatprep.subr.bf16.mxu0 %v6041_v17  ;;  %v6117_v16 = vld [vmem:[%s8806_s3 + $0xd20] ss:$76 sps:$4 sm:$0xff]   ;;  %v6120_v17 = vld [vmem:[%s8806_s3 + $0xd28] ss:$76 sps:$4 sm:$0xff]  }
 0x143   :  { %4279 = vmatprep.subr.bf16.mxu1 %v6044_v18  ;;  %v6125_v18 = vld [vmem:[%s8806_s3 + $0xdbc] ss:$76 sps:$4 sm:$0xff]  }
 0x145   :  { %4198 = vmatpush1.bf16.msra.mxu0 %v6039_v19  ;;  %v6128_v19 = vld [vmem:[%s8806_s3 + $0xdc4] ss:$76 sps:$4 sm:$0xff]  }
 0x146   :  { %4280 = vmatpush1.bf16.msra.mxu1 %v6042_v20  ;;  %4199 = vmatprep.subr.bf16.mxu0 %v6047_v22  ;;  %v6123_v20 = vld [vmem:[%s8806_s3 + $0xdb8] ss:$76 sps:$4 sm:$0xff]   ;;  %v6126_v22 = vld [vmem:[%s8806_s3 + $0xdc0] ss:$76 sps:$4 sm:$0xff]  }
 0x147   :  { %4281 = vmatprep.subr.bf16.mxu1 %v6050_v23  ;;  %v6131_v23 = vld [vmem:[%s8806_s3 + $0xe54] ss:$76 sps:$4 sm:$0xff]  }
 0x149   :  { %4200 = vmatpush1.bf16.msra.mxu0 %v6045_v24  ;;  %v6134_v24 = vld [vmem:[%s8806_s3 + $0xe5c] ss:$76 sps:$4 sm:$0xff]  }
 0x14a   :  { %4282 = vmatpush1.bf16.msra.mxu1 %v6048_v26  ;;  %4201 = vmatprep.subr.bf16.mxu0 %v6053_v27  ;;  %v6129_v26 = vld [vmem:[%s8806_s3 + $0xe50] ss:$76 sps:$4 sm:$0xff]   ;;  %v6132_v27 = vld [vmem:[%s8806_s3 + $0xe58] ss:$76 sps:$4 sm:$0xff]  }
 0x14b   :  { %4283 = vmatprep.subr.bf16.mxu1 %v6056_v28  ;;  %v6137_v28 = vld [vmem:[%s8806_s3 + $0xeec] ss:$76 sps:$4 sm:$0xff]  }
 0x14d   :  { %4202 = vmatpush1.bf16.msra.mxu0 %v6051_v30  ;;  %v6140_v30 = vld [vmem:[%s8806_s3 + $0xef4] ss:$76 sps:$4 sm:$0xff]  }
 0x14e   :  { %4284 = vmatpush1.bf16.msra.mxu1 %v6054_v32  ;;  %4203 = vmatprep.subr.bf16.mxu0 %v6059_v10  ;;  %v6135_v32 = vld [vmem:[%s8806_s3 + $0xee8] ss:$76 sps:$4 sm:$0xff]   ;;  %v6138_v10 = vld [vmem:[%s8806_s3 + $0xef0] ss:$76 sps:$4 sm:$0xff]  }
 0x14f   :  { %4285 = vmatprep.subr.bf16.mxu1 %v6062_v33  ;;  %v6143_v33 = vld [vmem:[%s8806_s3 + $0xf84] ss:$76 sps:$4 sm:$0xff]  }
 0x151   :  { %4204 = vmatpush1.bf16.msra.mxu0 %v6057_v34  ;;  %v6146_v34 = vld [vmem:[%s8806_s3 + $0xf8c] ss:$76 sps:$4 sm:$0xff]  }
 0x152   :  { %4286 = vmatpush1.bf16.msra.mxu1 %v6060_v35  ;;  %4205 = vmatprep.subr.bf16.mxu0 %v6065_v36  ;;  %v6141_v35 = vld [vmem:[%s8806_s3 + $0xf80] ss:$76 sps:$4 sm:$0xff]   ;;  %v6144_v36 = vld [vmem:[%s8806_s3 + $0xf88] ss:$76 sps:$4 sm:$0xff]  }
 0x153   :  { %4287 = vmatprep.subr.bf16.mxu1 %v6068_v25  ;;  %v6149_v25 = vld [vmem:[%s8806_s3 + $0x101c] ss:$76 sps:$4 sm:$0xff]  }
 0x155   :  { %4206 = vmatpush1.bf16.msra.mxu0 %v6063_v38  ;;  %v6152_v38 = vld [vmem:[%s8806_s3 + $0x1024] ss:$76 sps:$4 sm:$0xff]  }
 0x156   :  { %4288 = vmatpush1.bf16.msra.mxu1 %v6066_v39  ;;  %4207 = vmatprep.subr.bf16.mxu0 %v6071_v40  ;;  %v6147_v39 = vld [vmem:[%s8806_s3 + $0x1018] ss:$76 sps:$4 sm:$0xff]   ;;  %v6150_v40 = vld [vmem:[%s8806_s3 + $0x1020] ss:$76 sps:$4 sm:$0xff]  }
 0x157   :  { %4289 = vmatprep.subr.bf16.mxu1 %v6074_v41  ;;  %v6155_v41 = vld [vmem:[%s8806_s3 + $0x10b4] ss:$76 sps:$4 sm:$0xff]  }
 0x159   :  { %4208 = vmatpush1.bf16.msra.mxu0 %v6069_v43  ;;  %v6158_v43 = vld [vmem:[%s8806_s3 + $0x10bc] ss:$76 sps:$4 sm:$0xff]  }
 0x15a   :  { %4290 = vmatpush1.bf16.msra.mxu1 %v6072_v44  ;;  %4209 = vmatprep.subr.bf16.mxu0 %v6077_v45  ;;  %v6153_v44 = vld [vmem:[%s8806_s3 + $0x10b0] ss:$76 sps:$4 sm:$0xff]   ;;  %v6156_v45 = vld [vmem:[%s8806_s3 + $0x10b8] ss:$76 sps:$4 sm:$0xff]  }
 0x15b   :  { %4291 = vmatprep.subr.bf16.mxu1 %v6080_v46  ;;  %v6161_v46 = vld [vmem:[%s8806_s3 + $0x114c] ss:$76 sps:$4 sm:$0xff]  }
 0x15d   :  { %4210 = vmatpush1.bf16.msra.mxu0 %v6075_v47  ;;  %v6164_v47 = vld [vmem:[%s8806_s3 + $0x1154] ss:$76 sps:$4 sm:$0xff]  }
 0x15e   :  { %4292 = vmatpush1.bf16.msra.mxu1 %v6078_v48  ;;  %4220 = vmatprep.subr.bf16.mxu0 %v6083_v49  ;;  %v6159_v48 = vld [vmem:[%s8806_s3 + $0x1148] ss:$76 sps:$4 sm:$0xff]   ;;  %v6162_v49 = vld [vmem:[%s8806_s3 + $0x1150] ss:$76 sps:$4 sm:$0xff]  }
 0x15f   :  { %4302 = vmatprep.subr.bf16.mxu1 %v6086_v50  ;;  %v6167_v50 = vld [vmem:[%s8806_s3 + $0x11e4] ss:$76 sps:$4 sm:$0xff]  }
 0x160   :  { %4212 = vmatmul.mubr.bf16.vlgmr.msra.gmra.mrb[4].mxu0 %v7050_v31 }
 0x161   :  { %4294 = vmatmul.mubr.bf16.vlgmr.msra.gmra.mrb[8].mxu1 %v7050_v31  ;;  %4221 = vmatpush1.bf16.msra.mxu0 %v6081_v51  ;;  %v6170_v51 = vld [vmem:[%s8806_s3 + $0x11ec] ss:$76 sps:$4 sm:$0xff]  }
 0x162   :  { %4252 = vmatprep.mubr.bf16.mxu0 %v7068_v37  ;;  %4303 = vmatpush1.bf16.msra.mxu1 %v6084_v52  ;;  %v6165_v52 = vld [vmem:[%s8806_s3 + $0x11e0] ss:$76 sps:$4 sm:$0xff]  }
 0x163   :  { %4334 = vmatprep.mubr.bf16.mxu1 %v7068_v37  ;;  %4222 = vmatprep.subr.bf16.mxu0 %v6089_v53  ;;  %v6168_v53 = vld [vmem:[%s8806_s3 + $0x11e8] ss:$76 sps:$4 sm:$0xff]  }
 0x164   :  { %4304 = vmatprep.subr.bf16.mxu1 %v6092_v54  ;;  %v6173_v54 = vld [vmem:[%s8806_s3 + $0x127c] ss:$76 sps:$4 sm:$0xff]  }
 0x165   :  { %4223 = vmatpush1.bf16.msra.mxu0 %v6087_v55  ;;  %v6176_v55 = vld [vmem:[%s8806_s3 + $0x1284] ss:$76 sps:$4 sm:$0xff]  }
 0x166   :  { %4305 = vmatpush1.bf16.msra.mxu1 %v6090_v56  ;;  %4224 = vmatprep.subr.bf16.mxu0 %v6095_v57  ;;  %v6171_v56 = vld [vmem:[%s8806_s3 + $0x1278] ss:$76 sps:$4 sm:$0xff]   ;;  %v6174_v57 = vld [vmem:[%s8806_s3 + $0x1280] ss:$76 sps:$4 sm:$0xff]  }
 0x167   :  { %4306 = vmatprep.subr.bf16.mxu1 %v6098_v58  ;;  %v6179_v58 = vld [vmem:[%s8806_s3 + $0x24] ss:$76 sps:$4 sm:$0xff]  }
 0x169   :  { %4225 = vmatpush1.bf16.msra.mxu0 %v6093_v59  ;;  %v6182_v59 = vld [vmem:[%s8806_s3 + $0x2c] ss:$76 sps:$4 sm:$0xff]  }
 0x16a   :  { %4307 = vmatpush1.bf16.msra.mxu1 %v6096_v60  ;;  %4226 = vmatprep.subr.bf16.mxu0 %v6101_v61  ;;  %v6177_v60 = vld [vmem:[%s8806_s3 + $0x20] ss:$76 sps:$4 sm:$0xff]   ;;  %v6180_v61 = vld [vmem:[%s8806_s3 + $0x28] ss:$76 sps:$4 sm:$0xff]  }
 0x16b   :  { %4308 = vmatprep.subr.bf16.mxu1 %v6104_v62  ;;  %v6185_v62 = vld [vmem:[%s8806_s3 + $0xbc] ss:$76 sps:$4 sm:$0xff]  }
 0x16d   :  { %4227 = vmatpush1.bf16.msra.mxu0 %v6099_v63  ;;  %v6188_v63 = vld [vmem:[%s8806_s3 + $0xc4] ss:$76 sps:$4 sm:$0xff]  }
 0x16e   :  { %4309 = vmatpush1.bf16.msra.mxu1 %v6102_v0  ;;  %4228 = vmatprep.subr.bf16.mxu0 %v6107_v1  ;;  %v6183_v0 = vld [vmem:[%s8806_s3 + $0xb8] ss:$76 sps:$4 sm:$0xff]   ;;  %v6186_v1 = vld [vmem:[%s8806_s3 + $0xc0] ss:$76 sps:$4 sm:$0xff]  }
 0x16f   :  { %4310 = vmatprep.subr.bf16.mxu1 %v6110_v2  ;;  %v6191_v2 = vld [vmem:[%s8806_s3 + $0x154] ss:$76 sps:$4 sm:$0xff]  }
 0x171   :  { %4229 = vmatpush1.bf16.msra.mxu0 %v6105_v3  ;;  %v6194_v3 = vld [vmem:[%s8806_s3 + $0x15c] ss:$76 sps:$4 sm:$0xff]  }
 0x172   :  { %4311 = vmatpush1.bf16.msra.mxu1 %v6108_v4  ;;  %4230 = vmatprep.subr.bf16.mxu0 %v6113_v5  ;;  %v6189_v4 = vld [vmem:[%s8806_s3 + $0x150] ss:$76 sps:$4 sm:$0xff]   ;;  %v6192_v5 = vld [vmem:[%s8806_s3 + $0x158] ss:$76 sps:$4 sm:$0xff]  }
 0x173   :  { %4312 = vmatprep.subr.bf16.mxu1 %v6116_v6  ;;  %v6197_v6 = vld [vmem:[%s8806_s3 + $0x1ec] ss:$76 sps:$4 sm:$0xff]  }
 0x175   :  { %4231 = vmatpush1.bf16.msra.mxu0 %v6111_v7  ;;  %v6200_v7 = vld [vmem:[%s8806_s3 + $0x1f4] ss:$76 sps:$4 sm:$0xff]  }
 0x176   :  { %4313 = vmatpush1.bf16.msra.mxu1 %v6114_v8  ;;  %4232 = vmatprep.subr.bf16.mxu0 %v6119_v13  ;;  %v6195_v8 = vld [vmem:[%s8806_s3 + $0x1e8] ss:$76 sps:$4 sm:$0xff]   ;;  %v6198_v13 = vld [vmem:[%s8806_s3 + $0x1f0] ss:$76 sps:$4 sm:$0xff]  }
 0x177   :  { %4314 = vmatprep.subr.bf16.mxu1 %v6122_v14  ;;  %v6203_v14 = vld [vmem:[%s8806_s3 + $0x284] ss:$76 sps:$4 sm:$0xff]  }
 0x179   :  { %4233 = vmatpush1.bf16.msra.mxu0 %v6117_v16  ;;  %v6206_v16 = vld [vmem:[%s8806_s3 + $0x28c] ss:$76 sps:$4 sm:$0xff]  }
 0x17a   :  { %4315 = vmatpush1.bf16.msra.mxu1 %v6120_v17  ;;  %4234 = vmatprep.subr.bf16.mxu0 %v6125_v18  ;;  %v6201_v17 = vld [vmem:[%s8806_s3 + $0x280] ss:$76 sps:$4 sm:$0xff]   ;;  %v6204_v18 = vld [vmem:[%s8806_s3 + $0x288] ss:$76 sps:$4 sm:$0xff]  }
 0x17b   :  { %4316 = vmatprep.subr.bf16.mxu1 %v6128_v19  ;;  %v6209_v19 = vld [vmem:[%s8806_s3 + $0x31c] ss:$76 sps:$4 sm:$0xff]  }
 0x17d   :  { %4235 = vmatpush1.bf16.msra.mxu0 %v6123_v20  ;;  %v6212_v20 = vld [vmem:[%s8806_s3 + $0x324] ss:$76 sps:$4 sm:$0xff]  }
 0x17e   :  { %4317 = vmatpush1.bf16.msra.mxu1 %v6126_v22  ;;  %4236 = vmatprep.subr.bf16.mxu0 %v6131_v23  ;;  %v6207_v22 = vld [vmem:[%s8806_s3 + $0x318] ss:$76 sps:$4 sm:$0xff]   ;;  %v6210_v23 = vld [vmem:[%s8806_s3 + $0x320] ss:$76 sps:$4 sm:$0xff]  }
 0x17f   :  { %4318 = vmatprep.subr.bf16.mxu1 %v6134_v24  ;;  %v6215_v24 = vld [vmem:[%s8806_s3 + $0x3b4] ss:$76 sps:$4 sm:$0xff]  }
 0x181   :  { %4237 = vmatpush1.bf16.msra.mxu0 %v6129_v26  ;;  %v6218_v26 = vld [vmem:[%s8806_s3 + $0x3bc] ss:$76 sps:$4 sm:$0xff]  }
 0x182   :  { %4319 = vmatpush1.bf16.msra.mxu1 %v6132_v27  ;;  %4238 = vmatprep.subr.bf16.mxu0 %v6137_v28  ;;  %v6213_v27 = vld [vmem:[%s8806_s3 + $0x3b0] ss:$76 sps:$4 sm:$0xff]   ;;  %v6216_v28 = vld [vmem:[%s8806_s3 + $0x3b8] ss:$76 sps:$4 sm:$0xff]  }
 0x183   :  { %4320 = vmatprep.subr.bf16.mxu1 %v6140_v30  ;;  %v6221_v30 = vld [vmem:[%s8806_s3 + $0x44c] ss:$76 sps:$4 sm:$0xff]  }
 0x185   :  { %4239 = vmatpush1.bf16.msra.mxu0 %v6135_v32  ;;  %v6224_v32 = vld [vmem:[%s8806_s3 + $0x454] ss:$76 sps:$4 sm:$0xff]  }
 0x186   :  { %4321 = vmatpush1.bf16.msra.mxu1 %v6138_v10  ;;  %4240 = vmatprep.subr.bf16.mxu0 %v6143_v33  ;;  %v6219_v10 = vld [vmem:[%s8806_s3 + $0x448] ss:$76 sps:$4 sm:$0xff]   ;;  %v6222_v33 = vld [vmem:[%s8806_s3 + $0x450] ss:$76 sps:$4 sm:$0xff]  }
 0x187   :  { %4322 = vmatprep.subr.bf16.mxu1 %v6146_v34  ;;  %v6227_v34 = vld [vmem:[%s8806_s3 + $0x4e4] ss:$76 sps:$4 sm:$0xff]  }
 0x189   :  { %4241 = vmatpush1.bf16.msra.mxu0 %v6141_v35  ;;  %v6230_v35 = vld [vmem:[%s8806_s3 + $0x4ec] ss:$76 sps:$4 sm:$0xff]  }
 0x18a   :  { %4323 = vmatpush1.bf16.msra.mxu1 %v6144_v36  ;;  %4242 = vmatprep.subr.bf16.mxu0 %v6149_v25  ;;  %v6225_v36 = vld [vmem:[%s8806_s3 + $0x4e0] ss:$76 sps:$4 sm:$0xff]   ;;  %v6228_v25 = vld [vmem:[%s8806_s3 + $0x4e8] ss:$76 sps:$4 sm:$0xff]  }
 0x18b   :  { %4324 = vmatprep.subr.bf16.mxu1 %v6152_v38  ;;  %v6233_v38 = vld [vmem:[%s8806_s3 + $0x57c] ss:$76 sps:$4 sm:$0xff]  }
 0x18d   :  { %4243 = vmatpush1.bf16.msra.mxu0 %v6147_v39  ;;  %v6236_v39 = vld [vmem:[%s8806_s3 + $0x584] ss:$76 sps:$4 sm:$0xff]  }
 0x18e   :  { %4325 = vmatpush1.bf16.msra.mxu1 %v6150_v40  ;;  %4244 = vmatprep.subr.bf16.mxu0 %v6155_v41  ;;  %v6231_v40 = vld [vmem:[%s8806_s3 + $0x578] ss:$76 sps:$4 sm:$0xff]   ;;  %v6234_v41 = vld [vmem:[%s8806_s3 + $0x580] ss:$76 sps:$4 sm:$0xff]  }
 0x18f   :  { %4326 = vmatprep.subr.bf16.mxu1 %v6158_v43  ;;  %v6239_v43 = vld [vmem:[%s8806_s3 + $0x614] ss:$76 sps:$4 sm:$0xff]  }
 0x191   :  { %4245 = vmatpush1.bf16.msra.mxu0 %v6153_v44  ;;  %v6242_v44 = vld [vmem:[%s8806_s3 + $0x61c] ss:$76 sps:$4 sm:$0xff]  }
 0x192   :  { %4327 = vmatpush1.bf16.msra.mxu1 %v6156_v45  ;;  %4246 = vmatprep.subr.bf16.mxu0 %v6161_v46  ;;  %v6237_v45 = vld [vmem:[%s8806_s3 + $0x610] ss:$76 sps:$4 sm:$0xff]   ;;  %v6240_v46 = vld [vmem:[%s8806_s3 + $0x618] ss:$76 sps:$4 sm:$0xff]  }
 0x193   :  { %4328 = vmatprep.subr.bf16.mxu1 %v6164_v47  ;;  %v6245_v47 = vld [vmem:[%s8806_s3 + $0x6ac] ss:$76 sps:$4 sm:$0xff]  }
 0x195   :  { %4247 = vmatpush1.bf16.msra.mxu0 %v6159_v48  ;;  %v6248_v48 = vld [vmem:[%s8806_s3 + $0x6b4] ss:$76 sps:$4 sm:$0xff]  }
 0x196   :  { %4329 = vmatpush1.bf16.msra.mxu1 %v6162_v49  ;;  %4248 = vmatprep.subr.bf16.mxu0 %v6167_v50  ;;  %v6243_v49 = vld [vmem:[%s8806_s3 + $0x6a8] ss:$76 sps:$4 sm:$0xff]   ;;  %v6246_v50 = vld [vmem:[%s8806_s3 + $0x6b0] ss:$76 sps:$4 sm:$0xff]  }
 0x197   :  { %4330 = vmatprep.subr.bf16.mxu1 %v6170_v51  ;;  %v6251_v51 = vld [vmem:[%s8806_s3 + $0x744] ss:$76 sps:$4 sm:$0xff]  }
 0x199   :  { %4249 = vmatpush1.bf16.msra.mxu0 %v6165_v52  ;;  %v6254_v52 = vld [vmem:[%s8806_s3 + $0x74c] ss:$76 sps:$4 sm:$0xff]  }
 0x19a   :  { %4331 = vmatpush1.bf16.msra.mxu1 %v6168_v53  ;;  %4250 = vmatprep.subr.bf16.mxu0 %v6173_v54  ;;  %v6249_v53 = vld [vmem:[%s8806_s3 + $0x740] ss:$76 sps:$4 sm:$0xff]   ;;  %v6252_v54 = vld [vmem:[%s8806_s3 + $0x748] ss:$76 sps:$4 sm:$0xff]  }
 0x19b   :  { %4332 = vmatprep.subr.bf16.mxu1 %v6176_v55  ;;  %v6257_v55 = vld [vmem:[%s8806_s3 + $0x7dc] ss:$76 sps:$4 sm:$0xff]  }
 0x19d   :  { %4251 = vmatpush1.bf16.msra.mxu0 %v6171_v56  ;;  %v6260_v56 = vld [vmem:[%s8806_s3 + $0x7e4] ss:$76 sps:$4 sm:$0xff]  }
 0x19e   :  { %4333 = vmatpush1.bf16.msra.mxu1 %v6174_v57  ;;  %4343 = vmatprep.subr.bf16.mxu0 %v6179_v58  ;;  %v6255_v57 = vld [vmem:[%s8806_s3 + $0x7d8] ss:$76 sps:$4 sm:$0xff]   ;;  %v6258_v58 = vld [vmem:[%s8806_s3 + $0x7e0] ss:$76 sps:$4 sm:$0xff]  }
 0x19f   :  { %4425 = vmatprep.subr.bf16.mxu1 %v6182_v59  ;;  %v6263_v59 = vld [vmem:[%s8806_s3 + $0x874] ss:$76 sps:$4 sm:$0xff]  }
 0x1a0   :  { %4253 = vmatmul.mubr.bf16.vlgmr.msra.gmra.mrb[4].mxu0 %v7249_v42 }
 0x1a1   :  { %4335 = vmatmul.mubr.bf16.vlgmr.msra.gmra.mrb[8].mxu1 %v7249_v42  ;;  %4344 = vmatpush1.bf16.msra.mxu0 %v6177_v60  ;;  %v6266_v60 = vld [vmem:[%s8806_s3 + $0x87c] ss:$76 sps:$4 sm:$0xff]  }
 0x1a2   :  { %4375 = vmatprep.mubr.bf16.mxu0 %v7048_v29  ;;  %4426 = vmatpush1.bf16.msra.mxu1 %v6180_v61  ;;  %v6261_v61 = vld [vmem:[%s8806_s3 + $0x870] ss:$76 sps:$4 sm:$0xff]  }
 0x1a3   :  { %4457 = vmatprep.mubr.bf16.mxu1 %v7048_v29  ;;  %4345 = vmatprep.subr.bf16.mxu0 %v6185_v62  ;;  %v6264_v62 = vld [vmem:[%s8806_s3 + $0x878] ss:$76 sps:$4 sm:$0xff]  }
 0x1a4   :  { %4427 = vmatprep.subr.bf16.mxu1 %v6188_v63  ;;  %v6269_v63 = vld [vmem:[%s8806_s3 + $0x90c] ss:$76 sps:$4 sm:$0xff]  }
 0x1a5   :  { %4346 = vmatpush1.bf16.msra.mxu0 %v6183_v0  ;;  %v6272_v0 = vld [vmem:[%s8806_s3 + $0x914] ss:$76 sps:$4 sm:$0xff]  }
 0x1a6   :  { %4428 = vmatpush1.bf16.msra.mxu1 %v6186_v1  ;;  %4347 = vmatprep.subr.bf16.mxu0 %v6191_v2  ;;  %v6267_v1 = vld [vmem:[%s8806_s3 + $0x908] ss:$76 sps:$4 sm:$0xff]   ;;  %v6270_v2 = vld [vmem:[%s8806_s3 + $0x910] ss:$76 sps:$4 sm:$0xff]  }
 0x1a7   :  { %4429 = vmatprep.subr.bf16.mxu1 %v6194_v3  ;;  %v6275_v3 = vld [vmem:[%s8806_s3 + $0x9a4] ss:$76 sps:$4 sm:$0xff]  }
 0x1a9   :  { %4348 = vmatpush1.bf16.msra.mxu0 %v6189_v4  ;;  %v6278_v4 = vld [vmem:[%s8806_s3 + $0x9ac] ss:$76 sps:$4 sm:$0xff]  }
 0x1aa   :  { %4430 = vmatpush1.bf16.msra.mxu1 %v6192_v5  ;;  %4349 = vmatprep.subr.bf16.mxu0 %v6197_v6  ;;  %v6273_v5 = vld [vmem:[%s8806_s3 + $0x9a0] ss:$76 sps:$4 sm:$0xff]   ;;  %v6276_v6 = vld [vmem:[%s8806_s3 + $0x9a8] ss:$76 sps:$4 sm:$0xff]  }
 0x1ab   :  { %4431 = vmatprep.subr.bf16.mxu1 %v6200_v7  ;;  %v6281_v7 = vld [vmem:[%s8806_s3 + $0xa3c] ss:$76 sps:$4 sm:$0xff]  }
 0x1ad   :  { %4350 = vmatpush1.bf16.msra.mxu0 %v6195_v8  ;;  %v6284_v8 = vld [vmem:[%s8806_s3 + $0xa44] ss:$76 sps:$4 sm:$0xff]  }
 0x1ae   :  { %4432 = vmatpush1.bf16.msra.mxu1 %v6198_v13  ;;  %4351 = vmatprep.subr.bf16.mxu0 %v6203_v14  ;;  %v6279_v13 = vld [vmem:[%s8806_s3 + $0xa38] ss:$76 sps:$4 sm:$0xff]   ;;  %v6282_v14 = vld [vmem:[%s8806_s3 + $0xa40] ss:$76 sps:$4 sm:$0xff]  }
 0x1af   :  { %4433 = vmatprep.subr.bf16.mxu1 %v6206_v16  ;;  %v6287_v16 = vld [vmem:[%s8806_s3 + $0xad4] ss:$76 sps:$4 sm:$0xff]  }
 0x1b1   :  { %4352 = vmatpush1.bf16.msra.mxu0 %v6201_v17  ;;  %v6290_v17 = vld [vmem:[%s8806_s3 + $0xadc] ss:$76 sps:$4 sm:$0xff]  }
 0x1b2   :  { %4434 = vmatpush1.bf16.msra.mxu1 %v6204_v18  ;;  %4353 = vmatprep.subr.bf16.mxu0 %v6209_v19  ;;  %v6285_v18 = vld [vmem:[%s8806_s3 + $0xad0] ss:$76 sps:$4 sm:$0xff]   ;;  %v6288_v19 = vld [vmem:[%s8806_s3 + $0xad8] ss:$76 sps:$4 sm:$0xff]  }
 0x1b3   :  { %4435 = vmatprep.subr.bf16.mxu1 %v6212_v20  ;;  %v6293_v20 = vld [vmem:[%s8806_s3 + $0xb6c] ss:$76 sps:$4 sm:$0xff]  }
 0x1b5   :  { %4354 = vmatpush1.bf16.msra.mxu0 %v6207_v22  ;;  %v6296_v22 = vld [vmem:[%s8806_s3 + $0xb74] ss:$76 sps:$4 sm:$0xff]  }
 0x1b6   :  { %4436 = vmatpush1.bf16.msra.mxu1 %v6210_v23  ;;  %4355 = vmatprep.subr.bf16.mxu0 %v6215_v24  ;;  %v6291_v23 = vld [vmem:[%s8806_s3 + $0xb68] ss:$76 sps:$4 sm:$0xff]   ;;  %v6294_v24 = vld [vmem:[%s8806_s3 + $0xb70] ss:$76 sps:$4 sm:$0xff]  }
 0x1b7   :  { %4437 = vmatprep.subr.bf16.mxu1 %v6218_v26  ;;  %v6299_v26 = vld [vmem:[%s8806_s3 + $0xc04] ss:$76 sps:$4 sm:$0xff]  }
 0x1b9   :  { %4356 = vmatpush1.bf16.msra.mxu0 %v6213_v27  ;;  %v6302_v27 = vld [vmem:[%s8806_s3 + $0xc0c] ss:$76 sps:$4 sm:$0xff]  }
 0x1ba   :  { %4438 = vmatpush1.bf16.msra.mxu1 %v6216_v28  ;;  %4357 = vmatprep.subr.bf16.mxu0 %v6221_v30  ;;  %v6297_v28 = vld [vmem:[%s8806_s3 + $0xc00] ss:$76 sps:$4 sm:$0xff]  }
 0x1bb   :  { %4439 = vmatprep.subr.bf16.mxu1 %v6224_v32  ;;  %v7894_v30 = vld [vmem:[%s8808_s4] sm:$0xff]  ;;  %v6300_v32 = vld [vmem:[%s8806_s3 + $0xc08] ss:$76 sps:$4 sm:$0xff]  }
 0x1bd   :  { %4358 = vmatpush1.bf16.msra.mxu0 %v6219_v10  ;;  %v6305_v10 = vld [vmem:[%s8806_s3 + $0xc9c] ss:$76 sps:$4 sm:$0xff]  }
 0x1be   :  { %4440 = vmatpush1.bf16.msra.mxu1 %v6222_v33  ;;  %4359 = vmatprep.subr.bf16.mxu0 %v6227_v34  ;;  %v6308_v33 = vld [vmem:[%s8806_s3 + $0xca4] ss:$76 sps:$4 sm:$0xff]   ;;  %v851_v34 = vrot.slane %v7894_v30, %v7020_v11 }
 0x1bf   :  { %4441 = vmatprep.subr.bf16.mxu1 %v6230_v35  ;;  %v859_v35 = vrot.slane %v7894_v30, %v7199_v21 }
 0x1c1   :  { %4360 = vmatpush1.bf16.msra.mxu0 %v6225_v36  ;;  %v855_v36 = vrot.slane %v7894_v30, %v7023_v12 }
 0x1c2   :  { %4442 = vmatpush1.bf16.msra.mxu1 %v6228_v25  ;;  %4361 = vmatprep.subr.bf16.mxu0 %v6233_v38  ;;  %v863_v25 = vrot.slane %v7894_v30, %v7030_v15  ;;  %v6303_v38 = vld [vmem:[%s8806_s3 + $0xc98] ss:$76 sps:$4 sm:$0xff]  }
 0x1c3   :  { %4443 = vmatprep.subr.bf16.mxu1 %v6236_v39  ;;  %v6306_v39 = vld [vmem:[%s8806_s3 + $0xca0] ss:$76 sps:$4 sm:$0xff]  }
 0x1c5   :  { %4362 = vmatpush1.bf16.msra.mxu0 %v6231_v40  ;;  %v6311_v40 = vld [vmem:[%s8806_s3 + $0xd34] ss:$76 sps:$4 sm:$0xff]  }
 0x1c6   :  { %4444 = vmatpush1.bf16.msra.mxu1 %v6234_v41  ;;  %4363 = vmatprep.subr.bf16.mxu0 %v6239_v43 }
 0x1c7   :  { %4445 = vmatprep.subr.bf16.mxu1 %v6242_v44  ;;  %v6314_v44 = vld [vmem:[%s8806_s3 + $0xd3c] ss:$76 sps:$4 sm:$0xff]  }
 0x1c9   :  { %4364 = vmatpush1.bf16.msra.mxu0 %v6237_v45 }
 0x1ca   :  { %4446 = vmatpush1.bf16.msra.mxu1 %v6240_v46  ;;  %4365 = vmatprep.subr.bf16.mxu0 %v6245_v47 }
 0x1cb   :  { %4447 = vmatprep.subr.bf16.mxu1 %v6248_v48 }
 0x1cd   :  { %4366 = vmatpush1.bf16.msra.mxu0 %v6243_v49  ;;  %v6309_v49 = vld [vmem:[%s8806_s3 + $0xd30] ss:$76 sps:$4 sm:$0xff]  }
 0x1ce   :  { %4448 = vmatpush1.bf16.msra.mxu1 %v6246_v50  ;;  %4367 = vmatprep.subr.bf16.mxu0 %v6251_v51 }
 0x1cf   :  { %4449 = vmatprep.subr.bf16.mxu1 %v6254_v52 }
 0x1d1   :  { %4368 = vmatpush1.bf16.msra.mxu0 %v6249_v53 }
 0x1d2   :  { %4450 = vmatpush1.bf16.msra.mxu1 %v6252_v54  ;;  %4369 = vmatprep.subr.bf16.mxu0 %v6257_v55  ;;  %v6312_v54 = vld [vmem:[%s8806_s3 + $0xd38] ss:$76 sps:$4 sm:$0xff]  }
 0x1d3   :  { %4451 = vmatprep.subr.bf16.mxu1 %v6260_v56  ;;  %v6317_v55 = vld [vmem:[%s8806_s3 + $0xdcc] ss:$76 sps:$4 sm:$0xff]  }
 0x1d5   :  { %4370 = vmatpush1.bf16.msra.mxu0 %v6255_v57 }
 0x1d6   :  { %4452 = vmatpush1.bf16.msra.mxu1 %v6258_v58  ;;  %4371 = vmatprep.subr.bf16.mxu0 %v6263_v59 }
 0x1d7   :  { %4453 = vmatprep.subr.bf16.mxu1 %v6266_v60 }
 0x1d9   :  { %4372 = vmatpush1.bf16.msra.mxu0 %v6261_v61 }
 0x1da   :  { %4454 = vmatpush1.bf16.msra.mxu1 %v6264_v62  ;;  %4373 = vmatprep.subr.bf16.mxu0 %v6269_v63  ;;  %v6320_v62 = vld [vmem:[%s8806_s3 + $0xdd4] ss:$76 sps:$4 sm:$0xff]  }
 0x1db   :  { %4455 = vmatprep.subr.bf16.mxu1 %v6272_v0  ;;  %v6315_v63 = vld [vmem:[%s8806_s3 + $0xdc8] ss:$76 sps:$4 sm:$0xff]   ;;  %v6318_v0 = vld [vmem:[%s8806_s3 + $0xdd0] ss:$76 sps:$4 sm:$0xff]  }
 0x1dd   :  { %4374 = vmatpush1.bf16.msra.mxu0 %v6267_v1  ;;  %v6323_v1 = vld [vmem:[%s8806_s3 + $0xe64] ss:$76 sps:$4 sm:$0xff]  }
 0x1de   :  { %4456 = vmatpush1.bf16.msra.mxu1 %v6270_v2  ;;  %4384 = vmatprep.subr.bf16.mxu0 %v6275_v3  ;;  %v6326_v2 = vld [vmem:[%s8806_s3 + $0xe6c] ss:$76 sps:$4 sm:$0xff]  }
 0x1df   :  { %4466 = vmatprep.subr.bf16.mxu1 %v6278_v4  ;;  %v6321_v3 = vld [vmem:[%s8806_s3 + $0xe60] ss:$76 sps:$4 sm:$0xff]   ;;  %v6324_v4 = vld [vmem:[%s8806_s3 + $0xe68] ss:$76 sps:$4 sm:$0xff]  }
 0x1e0   :  { %4376 = vmatmul.mubr.bf16.vlgmr.msra.gmra.mrb[8].mxu0 %v7050_v31 }
 0x1e1   :  { %4458 = vmatmul.mubr.bf16.vlgmr.msra.gmra.mrb[12].mxu1 %v7050_v31  ;;  %4385 = vmatpush1.bf16.msra.mxu0 %v6273_v5  ;;  %v6329_v5 = vld [vmem:[%s8806_s3 + $0xefc] ss:$76 sps:$4 sm:$0xff]  }
 0x1e2   :  { %4416 = vmatprep.mubr.bf16.mxu0 %v7068_v37  ;;  %4467 = vmatpush1.bf16.msra.mxu1 %v6276_v6  ;;  %v6332_v6 = vld [vmem:[%s8806_s3 + $0xf04] ss:$76 sps:$4 sm:$0xff]  }
 0x1e3   :  { %4498 = vmatprep.mubr.bf16.mxu1 %v7068_v37  ;;  %4386 = vmatprep.subr.bf16.mxu0 %v6281_v7  ;;  %v6327_v7 = vld [vmem:[%s8806_s3 + $0xef8] ss:$76 sps:$4 sm:$0xff]  }
 0x1e4   :  { %4468 = vmatprep.subr.bf16.mxu1 %v6284_v8 }
 0x1e5   :  { %4387 = vmatpush1.bf16.msra.mxu0 %v6279_v13  ;;  %v6330_v13 = vld [vmem:[%s8806_s3 + $0xf00] ss:$76 sps:$4 sm:$0xff]  }
 0x1e6   :  { %4469 = vmatpush1.bf16.msra.mxu1 %v6282_v14  ;;  %4388 = vmatprep.subr.bf16.mxu0 %v6287_v16  ;;  %v6335_v14 = vld [vmem:[%s8806_s3 + $0xf94] ss:$76 sps:$4 sm:$0xff]  }
 0x1e7   :  { %4470 = vmatprep.subr.bf16.mxu1 %v6290_v17 }
 0x1e9   :  { %4389 = vmatpush1.bf16.msra.mxu0 %v6285_v18  ;;  %v6338_v18 = vld [vmem:[%s8806_s3 + $0xf9c] ss:$76 sps:$4 sm:$0xff]  }
 0x1ea   :  { %4471 = vmatpush1.bf16.msra.mxu1 %v6288_v19  ;;  %4390 = vmatprep.subr.bf16.mxu0 %v6293_v20 }
 0x1eb   :  { %4472 = vmatprep.subr.bf16.mxu1 %v6296_v22 }
 0x1ed   :  { %4391 = vmatpush1.bf16.msra.mxu0 %v6291_v23 }
 0x1ee   :  { %4473 = vmatpush1.bf16.msra.mxu1 %v6294_v24  ;;  %4392 = vmatprep.subr.bf16.mxu0 %v6299_v26  ;;  %v6333_v24 = vld [vmem:[%s8806_s3 + $0xf90] ss:$76 sps:$4 sm:$0xff]  }
 0x1ef   :  { %4474 = vmatprep.subr.bf16.mxu1 %v6302_v27  ;;  %v6336_v27 = vld [vmem:[%s8806_s3 + $0xf98] ss:$76 sps:$4 sm:$0xff]  }
 0x1f1   :  { %4393 = vmatpush1.bf16.msra.mxu0 %v6297_v28  ;;  %v6341_v28 = vld [vmem:[%s8806_s3 + $0x102c] ss:$76 sps:$4 sm:$0xff]  }
 0x1f2   :  { %4475 = vmatpush1.bf16.msra.mxu1 %v6300_v32  ;;  %4394 = vmatprep.subr.bf16.mxu0 %v6305_v10  ;;  %v6344_v32 = vld [vmem:[%s8806_s3 + $0x1034] ss:$76 sps:$4 sm:$0xff]   ;;  %v6766_v10 = vmov 1983009808  }
 0x1f3   :  { %v4090_v41 = vpop.f32.mrb[0].mxu0  ;;  %v4172_v43 = vpop.f32.mrb[4].mxu1  ;;  %4476 = vmatprep.subr.bf16.mxu1 %v6308_v33  ;;  %v4969_v33 = vunpack.c.l.s4 %v6766_v10  ;;  %v6402_v10 = vld [vmem:[%s8806_s3 + $0x330] ss:$76 sps:$4 sm:$0xff]  }
 0x1f4   :  { %v5737_v45 = vadd.f32 %v4090_v41, %v851_v34  ;;  %v5739_v46 = vadd.f32 %v4172_v43, %v859_v35  ;;  %v4092_v47 = vpop.f32.mrb[1].mxu0  ;;  %v4174_v48 = vpop.f32.mrb[5].mxu1  ;;  %v6339_v34 = vld [vmem:[%s8806_s3 + $0x1028] ss:$76 sps:$4 sm:$0xff]   ;;  %v6342_v35 = vld [vmem:[%s8806_s3 + $0x1030] ss:$76 sps:$4 sm:$0xff]  }
 0x1f5   :  { %v5738_v50 = vadd.f32 %v4092_v47, %v855_v36  ;;  %v5740_v51 = vadd.f32 %v4174_v48, %v863_v25  ;;  %v4094_v52 = vpop.f32.mrb[2].mxu0  ;;  %v4176_v53 = vpop.f32.mrb[6].mxu1  ;;  %4395 = vmatpush1.bf16.msra.mxu0 %v6303_v38  ;;  %v6347_v36 = vld [vmem:[%s8806_s3 + $0x10c4] ss:$76 sps:$4 sm:$0xff]   ;;  %v6350_v25 = vld [vmem:[%s8806_s3 + $0x10cc] ss:$76 sps:$4 sm:$0xff]   ;;  %v4970_v38 = vunpack.c.0.s8 %v4969_v33 }
 0x1f6   :  { %v5674_v56 = vmul.f32 -1.442695, %v5737_v45  ;;  %v5676_v57 = vmul.f32 -1.442695, %v5739_v46  ;;  %4477 = vmatpush1.bf16.msra.mxu1 %v6306_v39  ;;  %v4095_v58 = vpop.f32.mrb[3].mxu0  ;;  %v4177_v59 = vpop.f32.mrb[7].mxu1  ;;  %4396 = vmatprep.subr.bf16.mxu0 %v6311_v40 }
 0x1f7   :  { %v5675_v60 = vmul.f32 -1.442695, %v5738_v50  ;;  %v5677_v61 = vmul.f32 -1.442695, %v5740_v51  ;;  %4478 = vmatprep.subr.bf16.mxu1 %v6314_v44  ;;  %v6345_v39 = vld [vmem:[%s8806_s3 + $0x10c0] ss:$76 sps:$4 sm:$0xff]   ;;  %v8010_v46 = vsub.s32 %v4970_v38, %v7012_v9 }
 0x1f8   :  { %6689 = vpow2.f32 %v5674_v56  ;;  %v6348_v40 = vld [vmem:[%s8806_s3 + $0x10c8] ss:$76 sps:$4 sm:$0xff]   ;;  %v6356_v44 = vld [vmem:[%s8806_s3 + $0x1164] ss:$76 sps:$4 sm:$0xff]   ;;  %v6354_v51 = vld [vmem:[%s8806_s3 + $0x1160] ss:$76 sps:$4 sm:$0xff]  }
 0x1f9   :  { %6691 = vpow2.f32 %v5676_v57  ;;  %4397 = vmatpush1.bf16.msra.mxu0 %v6309_v49  ;;  %v6353_v41 = vld [vmem:[%s8806_s3 + $0x115c] ss:$76 sps:$4 sm:$0xff]   ;;  %v6351_v48 = vld [vmem:[%s8806_s3 + $0x1158] ss:$76 sps:$4 sm:$0xff]   ;;  %v6359_v52 = vld [vmem:[%s8806_s3 + $0x11f4] ss:$76 sps:$4 sm:$0xff]  }
 0x1fa   :  { %6693 = vpow2.f32 %v5675_v60  ;;  %4479 = vmatpush1.bf16.msra.mxu1 %v6312_v54  ;;  %4398 = vmatprep.subr.bf16.mxu0 %v6317_v55  ;;  %v6362_v54 = vld [vmem:[%s8806_s3 + $0x11fc] ss:$76 sps:$4 sm:$0xff]   ;;  %v6360_v58 = vld [vmem:[%s8806_s3 + $0x11f8] ss:$76 sps:$4 sm:$0xff]  }
 0x1fb   :  { %6695 = vpow2.f32 %v5677_v61  ;;  %4480 = vmatprep.subr.bf16.mxu1 %v6320_v62  ;;  %v6357_v57 = vld [vmem:[%s8806_s3 + $0x11f0] ss:$76 sps:$4 sm:$0xff]   ;;  %v6365_v59 = vld [vmem:[%s8806_s3 + $0x128c] ss:$76 sps:$4 sm:$0xff]   ;;  %v6368_v61 = vld [vmem:[%s8806_s3 + $0x1294] ss:$76 sps:$4 sm:$0xff]  }
 0x1fc   :  { %v6363_v62 = vld [vmem:[%s8806_s3 + $0x1288] ss:$76 sps:$4 sm:$0xff]   ;;  %v6407_v33 = vld [vmem:[%s8806_s3 + $0x3c4] ss:$76 sps:$4 sm:$0xff]  }
 0x1fd   :  { %4399 = vmatpush1.bf16.msra.mxu0 %v6315_v63  ;;  %v6366_v63 = vld [vmem:[%s8806_s3 + $0x1290] ss:$76 sps:$4 sm:$0xff]  }
 0x1fe   :  { %4481 = vmatpush1.bf16.msra.mxu1 %v6318_v0  ;;  %4400 = vmatprep.subr.bf16.mxu0 %v6323_v1  ;;  %v6371_v0 = vld [vmem:[%s8806_s3 + $0x34] ss:$76 sps:$4 sm:$0xff]   ;;  %v6374_v1 = vld [vmem:[%s8806_s3 + $0x3c] ss:$76 sps:$4 sm:$0xff]   ;;  %v6416_v38 = vld [vmem:[%s8806_s3 + $0x464] ss:$76 sps:$4 sm:$0xff]  }
 0x1ff   :  { %4482 = vmatprep.subr.bf16.mxu1 %v6326_v2  ;;  %v6369_v2 = vld [vmem:[%s8806_s3 + $0x30] ss:$76 sps:$4 sm:$0xff]  }
 0x201   :  { %4401 = vmatpush1.bf16.msra.mxu0 %v6321_v3  ;;  %v6372_v3 = vld [vmem:[%s8806_s3 + $0x38] ss:$76 sps:$4 sm:$0xff]  }
 0x202   :  { %v6690_v8 = vpop.eup %6689  ;;  %4483 = vmatpush1.bf16.msra.mxu1 %v6324_v4  ;;  %4402 = vmatprep.subr.bf16.mxu0 %v6329_v5  ;;  %v6377_v4 = vld [vmem:[%s8806_s3 + $0xcc] ss:$76 sps:$4 sm:$0xff]   ;;  %v6380_v5 = vld [vmem:[%s8806_s3 + $0xd4] ss:$76 sps:$4 sm:$0xff]  }
 0x203   :  { %v6692_v16 = vpop.eup %6691  ;;  %v4890_v17 = vadd.f32 1.0, %v6690_v8  ;;  %4484 = vmatprep.subr.bf16.mxu1 %v6332_v6  ;;  %v6375_v6 = vld [vmem:[%s8806_s3 + $0xc8] ss:$76 sps:$4 sm:$0xff]   ;;  %v6383_v8 = vld [vmem:[%s8806_s3 + $0x164] ss:$76 sps:$4 sm:$0xff]  }
 0x204   :  { %v6694_v19 = vpop.eup %6693  ;;  %v4892_v20 = vadd.f32 1.0, %v6692_v16  ;;  %v6384_v16 = vld [vmem:[%s8806_s3 + $0x168] ss:$76 sps:$4 sm:$0xff]  }
 0x205   :  { %v6696_v22 = vpop.eup %6695  ;;  %6697 = vrcp.f32 %v4890_v17  ;;  %v4891_v23 = vadd.f32 1.0, %v6694_v19  ;;  %4403 = vmatpush1.bf16.msra.mxu0 %v6327_v7  ;;  %v6378_v7 = vld [vmem:[%s8806_s3 + $0xd0] ss:$76 sps:$4 sm:$0xff]   ;;  %v6387_v19 = vld [vmem:[%s8806_s3 + $0x1f8] ss:$76 sps:$4 sm:$0xff]  }
 0x206   :  { %6699 = vrcp.f32 %v4892_v20  ;;  %v4893_v26 = vadd.f32 1.0, %v6696_v22  ;;  %4485 = vmatpush1.bf16.msra.mxu1 %v6330_v13  ;;  %4404 = vmatprep.subr.bf16.mxu0 %v6335_v14  ;;  %v6386_v13 = vld [vmem:[%s8806_s3 + $0x16c] ss:$76 sps:$4 sm:$0xff]   ;;  %v6389_v17 = vld [vmem:[%s8806_s3 + $0x1fc] ss:$76 sps:$4 sm:$0xff]  }
 0x207   :  { %6701 = vrcp.f32 %v4891_v23  ;;  %4486 = vmatprep.subr.bf16.mxu1 %v6338_v18  ;;  %v6381_v14 = vld [vmem:[%s8806_s3 + $0x160] ss:$76 sps:$4 sm:$0xff]   ;;  %v6392_v18 = vld [vmem:[%s8806_s3 + $0x204] ss:$76 sps:$4 sm:$0xff]   ;;  %v6398_v23 = vld [vmem:[%s8806_s3 + $0x29c] ss:$76 sps:$4 sm:$0xff]  }
 0x208   :  { %6703 = vrcp.f32 %v4893_v26  ;;  %v6390_v20 = vld [vmem:[%s8806_s3 + $0x200] ss:$76 sps:$4 sm:$0xff]   ;;  %v6396_v26 = vld [vmem:[%s8806_s3 + $0x298] ss:$76 sps:$4 sm:$0xff]  }
 0x209   :  { %4405 = vmatpush1.bf16.msra.mxu0 %v6333_v24  ;;  %v6395_v22 = vld [vmem:[%s8806_s3 + $0x294] ss:$76 sps:$4 sm:$0xff]   ;;  %v6393_v24 = vld [vmem:[%s8806_s3 + $0x290] ss:$76 sps:$4 sm:$0xff]  }
 0x20a   :  { %4487 = vmatpush1.bf16.msra.mxu1 %v6336_v27  ;;  %4406 = vmatprep.subr.bf16.mxu0 %v6341_v28  ;;  %v6401_v27 = vld [vmem:[%s8806_s3 + $0x32c] ss:$76 sps:$4 sm:$0xff]   ;;  %v6404_v28 = vld [vmem:[%s8806_s3 + $0x334] ss:$76 sps:$4 sm:$0xff]  }
 0x20b   :  { %4488 = vmatprep.subr.bf16.mxu1 %v6344_v32  ;;  %v6399_v32 = vld [vmem:[%s8806_s3 + $0x328] ss:$76 sps:$4 sm:$0xff]  }
 0x20d   :  { %4407 = vmatpush1.bf16.msra.mxu0 %v6339_v34  ;;  %v6410_v34 = vld [vmem:[%s8806_s3 + $0x3cc] ss:$76 sps:$4 sm:$0xff]  }
 0x20e   :  { %4489 = vmatpush1.bf16.msra.mxu1 %v6342_v35  ;;  %4408 = vmatprep.subr.bf16.mxu0 %v6347_v36  ;;  %v6405_v35 = vld [vmem:[%s8806_s3 + $0x3c0] ss:$76 sps:$4 sm:$0xff]   ;;  %v6408_v36 = vld [vmem:[%s8806_s3 + $0x3c8] ss:$76 sps:$4 sm:$0xff]  }
 0x20f   :  { %v6698_v43 = vpop.eup %6697  ;;  %4490 = vmatprep.subr.bf16.mxu1 %v6350_v25  ;;  %v6413_v25 = vld [vmem:[%s8806_s3 + $0x45c] ss:$76 sps:$4 sm:$0xff]  }
 0x210   :  { %v6700_v45 = vpop.eup %6699 }
 0x211   :  { %v6702_v47 = vpop.eup %6701  ;;  %4409 = vmatpush1.bf16.msra.mxu0 %v6345_v39  ;;  %v6411_v39 = vld [vmem:[%s8806_s3 + $0x458] ss:$76 sps:$4 sm:$0xff]  }
 0x212   :  { %v6704_v49 = vpop.eup %6703  ;;  %v4966_v50 = vcombine.low %v6698_v43, %v6702_v47  ;;  %4491 = vmatpush1.bf16.msra.mxu1 %v6348_v40  ;;  %4410 = vmatprep.subr.bf16.mxu0 %v6353_v41  ;;  %v6414_v40 = vld [vmem:[%s8806_s3 + $0x460] ss:$76 sps:$4 sm:$0xff]   ;;  %v6422_v43 = vld [vmem:[%s8806_s3 + $0x4fc] ss:$76 sps:$4 sm:$0xff]  }
 0x213   :  { %v4967_v53 = vcombine.low %v6700_v45, %v6704_v49  ;;  %4492 = vmatprep.subr.bf16.mxu1 %v6356_v44  ;;  %v6419_v41 = vld [vmem:[%s8806_s3 + $0x4f4] ss:$76 sps:$4 sm:$0xff]   ;;  %v6417_v44 = vld [vmem:[%s8806_s3 + $0x4f0] ss:$76 sps:$4 sm:$0xff]   ;;  %v6420_v45 = vld [vmem:[%s8806_s3 + $0x4f8] ss:$76 sps:$4 sm:$0xff]  }
 0x214   :  { %v4974_v55 = vrot.slane %v4966_v50, %v8010_v46  ;;  %v6425_v47 = vld [vmem:[%s8806_s3 + $0x58c] ss:$76 sps:$4 sm:$0xff]   ;;  %v6423_v49 = vld [vmem:[%s8806_s3 + $0x588] ss:$76 sps:$4 sm:$0xff]   ;;  %v6426_v50 = vld [vmem:[%s8806_s3 + $0x590] ss:$76 sps:$4 sm:$0xff]  }
 0x215   :  { %v4981_v56 = vrot.slane %v4967_v53, %v8010_v46  ;;  %4411 = vmatpush1.bf16.msra.mxu0 %v6351_v48  ;;  %v6428_v48 = vld [vmem:[%s8806_s3 + $0x594] ss:$76 sps:$4 sm:$0xff]  }
 0x216   :  { %4493 = vmatpush1.bf16.msra.mxu1 %v6354_v51  ;;  %4412 = vmatprep.subr.bf16.mxu0 %v6359_v52  ;;  %v6431_v51 = vld [vmem:[%s8806_s3 + $0x624] ss:$76 sps:$4 sm:$0xff]   ;;  %v6434_v52 = vld [vmem:[%s8806_s3 + $0x62c] ss:$76 sps:$4 sm:$0xff]  }
 0x217   :  { %v4982_v60 = vcombine.low %v4974_v55, %v4981_v56  ;;  %4494 = vmatprep.subr.bf16.mxu1 %v6362_v54  ;;  %v6429_v53 = vld [vmem:[%s8806_s3 + $0x620] ss:$76 sps:$4 sm:$0xff]   ;;  %v6432_v54 = vld [vmem:[%s8806_s3 + $0x628] ss:$76 sps:$4 sm:$0xff]   ;;  %v6440_v56 = vld [vmem:[%s8806_s3 + $0x6c4] ss:$76 sps:$4 sm:$0xff]  }
 0x218   :  { %v6437_v55 = vld [vmem:[%s8806_s3 + $0x6bc] ss:$76 sps:$4 sm:$0xff]  }
 0x219   :  { %5055 = vst [vmem:[%s8809_s5] sm:$0xff] %v4982_v60  ;;  %4413 = vmatpush1.bf16.msra.mxu0 %v6357_v57  ;;  %v6435_v57 = vld [vmem:[%s8806_s3 + $0x6b8] ss:$76 sps:$4 sm:$0xff]   ;;  %v6446_v60 = vld [vmem:[%s8806_s3 + $0x75c] ss:$76 sps:$4 sm:$0xff]  }
 0x21a   :  { %4495 = vmatpush1.bf16.msra.mxu1 %v6360_v58  ;;  %4414 = vmatprep.subr.bf16.mxu0 %v6365_v59  ;;  %v6438_v58 = vld [vmem:[%s8806_s3 + $0x6c0] ss:$76 sps:$4 sm:$0xff]  }
 0x21b   :  { %4496 = vmatprep.subr.bf16.mxu1 %v6368_v61  ;;  %v6443_v59 = vld [vmem:[%s8806_s3 + $0x754] ss:$76 sps:$4 sm:$0xff]   ;;  %v6441_v61 = vld [vmem:[%s8806_s3 + $0x750] ss:$76 sps:$4 sm:$0xff]  }
 0x21d   :  { %4415 = vmatpush1.bf16.msra.mxu0 %v6363_v62  ;;  %v6444_v62 = vld [vmem:[%s8806_s3 + $0x758] ss:$76 sps:$4 sm:$0xff]  }
 0x21e   :  { %4497 = vmatpush1.bf16.msra.mxu1 %v6366_v63  ;;  %4507 = vmatprep.subr.bf16.mxu0 %v6371_v0  ;;  %v6449_v63 = vld [vmem:[%s8806_s3 + $0x7ec] ss:$76 sps:$4 sm:$0xff]   ;;  %v6452_v0 = vld [vmem:[%s8806_s3 + $0x7f4] ss:$76 sps:$4 sm:$0xff]  }
 0x21f   :  { %4589 = vmatprep.subr.bf16.mxu1 %v6374_v1  ;;  %v6447_v1 = vld [vmem:[%s8806_s3 + $0x7e8] ss:$76 sps:$4 sm:$0xff]  }
 0x220   :  { %4417 = vmatmul.mubr.bf16.vlgmr.msra.gmra.mrb[8].mxu0 %v7249_v42 }
 0x221   :  { %4499 = vmatmul.mubr.bf16.vlgmr.msra.gmra.mrb[12].mxu1 %v7249_v42  ;;  %4508 = vmatpush1.bf16.msra.mxu0 %v6369_v2  ;;  %v6450_v2 = vld [vmem:[%s8806_s3 + $0x7f0] ss:$76 sps:$4 sm:$0xff]  }
 0x222   :  { %4539 = vmatprep.mubr.bf16.mxu0 %v7048_v29  ;;  %4590 = vmatpush1.bf16.msra.mxu1 %v6372_v3  ;;  %v6455_v3 = vld [vmem:[%s8806_s3 + $0x884] ss:$76 sps:$4 sm:$0xff]  }
 0x223   :  { %4621 = vmatprep.mubr.bf16.mxu1 %v7048_v29  ;;  %4509 = vmatprep.subr.bf16.mxu0 %v6377_v4  ;;  %v6458_v4 = vld [vmem:[%s8806_s3 + $0x88c] ss:$76 sps:$4 sm:$0xff]  }
 0x224   :  { %4591 = vmatprep.subr.bf16.mxu1 %v6380_v5  ;;  %v6453_v5 = vld [vmem:[%s8806_s3 + $0x880] ss:$76 sps:$4 sm:$0xff]  }
 0x225   :  { %4510 = vmatpush1.bf16.msra.mxu0 %v6375_v6  ;;  %v6456_v6 = vld [vmem:[%s8806_s3 + $0x888] ss:$76 sps:$4 sm:$0xff]  }
 0x226   :  { %4592 = vmatpush1.bf16.msra.mxu1 %v6378_v7  ;;  %4511 = vmatprep.subr.bf16.mxu0 %v6383_v8  ;;  %v6461_v7 = vld [vmem:[%s8806_s3 + $0x91c] ss:$76 sps:$4 sm:$0xff]   ;;  %v6464_v8 = vld [vmem:[%s8806_s3 + $0x924] ss:$76 sps:$4 sm:$0xff]  }
 0x227   :  { %4593 = vmatprep.subr.bf16.mxu1 %v6386_v13  ;;  %v6459_v13 = vld [vmem:[%s8806_s3 + $0x918] ss:$76 sps:$4 sm:$0xff]  }
 0x229   :  { %4512 = vmatpush1.bf16.msra.mxu0 %v6381_v14  ;;  %v6462_v14 = vld [vmem:[%s8806_s3 + $0x920] ss:$76 sps:$4 sm:$0xff]  }
 0x22a   :  { %4594 = vmatpush1.bf16.msra.mxu1 %v6384_v16  ;;  %4513 = vmatprep.subr.bf16.mxu0 %v6389_v17  ;;  %v6467_v16 = vld [vmem:[%s8806_s3 + $0x9b4] ss:$76 sps:$4 sm:$0xff]   ;;  %v6470_v17 = vld [vmem:[%s8806_s3 + $0x9bc] ss:$76 sps:$4 sm:$0xff]  }
 0x22b   :  { %4595 = vmatprep.subr.bf16.mxu1 %v6392_v18  ;;  %v6465_v18 = vld [vmem:[%s8806_s3 + $0x9b0] ss:$76 sps:$4 sm:$0xff]  }
 0x22d   :  { %4514 = vmatpush1.bf16.msra.mxu0 %v6387_v19  ;;  %v6468_v19 = vld [vmem:[%s8806_s3 + $0x9b8] ss:$76 sps:$4 sm:$0xff]  }
 0x22e   :  { %4596 = vmatpush1.bf16.msra.mxu1 %v6390_v20  ;;  %4515 = vmatprep.subr.bf16.mxu0 %v6395_v22  ;;  %v6473_v20 = vld [vmem:[%s8806_s3 + $0xa4c] ss:$76 sps:$4 sm:$0xff]   ;;  %v6476_v22 = vld [vmem:[%s8806_s3 + $0xa54] ss:$76 sps:$4 sm:$0xff]  }
 0x22f   :  { %4597 = vmatprep.subr.bf16.mxu1 %v6398_v23  ;;  %v6471_v23 = vld [vmem:[%s8806_s3 + $0xa48] ss:$76 sps:$4 sm:$0xff]  }
 0x231   :  { %4516 = vmatpush1.bf16.msra.mxu0 %v6393_v24  ;;  %v6474_v24 = vld [vmem:[%s8806_s3 + $0xa50] ss:$76 sps:$4 sm:$0xff]  }
 0x232   :  { %4598 = vmatpush1.bf16.msra.mxu1 %v6396_v26  ;;  %4517 = vmatprep.subr.bf16.mxu0 %v6401_v27  ;;  %v6479_v26 = vld [vmem:[%s8806_s3 + $0xae4] ss:$76 sps:$4 sm:$0xff]   ;;  %v6482_v27 = vld [vmem:[%s8806_s3 + $0xaec] ss:$76 sps:$4 sm:$0xff]  }
 0x233   :  { %4599 = vmatprep.subr.bf16.mxu1 %v6404_v28  ;;  %v6477_v28 = vld [vmem:[%s8806_s3 + $0xae0] ss:$76 sps:$4 sm:$0xff]  }
 0x235   :  { %4518 = vmatpush1.bf16.msra.mxu0 %v6399_v32  ;;  %v6480_v32 = vld [vmem:[%s8806_s3 + $0xae8] ss:$76 sps:$4 sm:$0xff]  }
 0x236   :  { %4600 = vmatpush1.bf16.msra.mxu1 %v6402_v10  ;;  %4519 = vmatprep.subr.bf16.mxu0 %v6407_v33  ;;  %v6485_v10 = vld [vmem:[%s8806_s3 + $0xb7c] ss:$76 sps:$4 sm:$0xff]   ;;  %v6488_v33 = vld [vmem:[%s8806_s3 + $0xb84] ss:$76 sps:$4 sm:$0xff]  }
 0x237   :  { %4601 = vmatprep.subr.bf16.mxu1 %v6410_v34  ;;  %v6483_v34 = vld [vmem:[%s8806_s3 + $0xb78] ss:$76 sps:$4 sm:$0xff]  }
 0x239   :  { %4520 = vmatpush1.bf16.msra.mxu0 %v6405_v35  ;;  %v6486_v35 = vld [vmem:[%s8806_s3 + $0xb80] ss:$76 sps:$4 sm:$0xff]  }
 0x23a   :  { %4602 = vmatpush1.bf16.msra.mxu1 %v6408_v36  ;;  %4521 = vmatprep.subr.bf16.mxu0 %v6413_v25  ;;  %v6491_v36 = vld [vmem:[%s8806_s3 + $0xc14] ss:$76 sps:$4 sm:$0xff]   ;;  %v6494_v25 = vld [vmem:[%s8806_s3 + $0xc1c] ss:$76 sps:$4 sm:$0xff]  }
 0x23b   :  { %4603 = vmatprep.subr.bf16.mxu1 %v6416_v38  ;;  %v866_v38 = vsub.s32 4, %v7012_v9 }
 0x23d   :  { %4522 = vmatpush1.bf16.msra.mxu0 %v6411_v39  ;;  %v6489_v39 = vld [vmem:[%s8806_s3 + $0xc10] ss:$76 sps:$4 sm:$0xff]  }
 0x23e   :  { %4604 = vmatpush1.bf16.msra.mxu1 %v6414_v40  ;;  %4523 = vmatprep.subr.bf16.mxu0 %v6419_v41  ;;  %v874_v40 = vsub.s32 6, %v7012_v9  ;;  %v870_v41 = vsub.s32 5, %v7012_v9 }
 0x23f   :  { %4605 = vmatprep.subr.bf16.mxu1 %v6422_v43  ;;  %v6492_v43 = vld [vmem:[%s8806_s3 + $0xc18] ss:$76 sps:$4 sm:$0xff]  }
 0x241   :  { %4524 = vmatpush1.bf16.msra.mxu0 %v6417_v44  ;;  %v878_v44 = vsub.s32 7, %v7012_v9 }
 0x242   :  { %4606 = vmatpush1.bf16.msra.mxu1 %v6420_v45  ;;  %4525 = vmatprep.subr.bf16.mxu0 %v6425_v47  ;;  %v6497_v45 = vld [vmem:[%s8806_s3 + $0xcac] ss:$76 sps:$4 sm:$0xff]   ;;  %v6500_v47 = vld [vmem:[%s8806_s3 + $0xcb4] ss:$76 sps:$4 sm:$0xff]  }
 0x243   :  { %4607 = vmatprep.subr.bf16.mxu1 %v6428_v48  ;;  %v867_v48 = vrot.slane %v7894_v30, %v866_v38 }
 0x245   :  { %4526 = vmatpush1.bf16.msra.mxu0 %v6423_v49  ;;  %v875_v49 = vrot.slane %v7894_v30, %v874_v40 }
 0x246   :  { %4608 = vmatpush1.bf16.msra.mxu1 %v6426_v50  ;;  %4527 = vmatprep.subr.bf16.mxu0 %v6431_v51  ;;  %v871_v50 = vrot.slane %v7894_v30, %v870_v41  ;;  %v6495_v51 = vld [vmem:[%s8806_s3 + $0xca8] ss:$76 sps:$4 sm:$0xff]  }
 0x247   :  { %4609 = vmatprep.subr.bf16.mxu1 %v6434_v52  ;;  %v879_v52 = vrot.slane %v7894_v30, %v878_v44  ;;  %v6501_v30 = vld [vmem:[%s8806_s3 + $0xd40] ss:$76 sps:$4 sm:$0xff]  }
 0x249   :  { %4528 = vmatpush1.bf16.msra.mxu0 %v6429_v53  ;;  %v6498_v53 = vld [vmem:[%s8806_s3 + $0xcb0] ss:$76 sps:$4 sm:$0xff]  }
 0x24a   :  { %4610 = vmatpush1.bf16.msra.mxu1 %v6432_v54  ;;  %4529 = vmatprep.subr.bf16.mxu0 %v6437_v55  ;;  %v6503_v54 = vld [vmem:[%s8806_s3 + $0xd44] ss:$76 sps:$4 sm:$0xff]  }
 0x24b   :  { %4611 = vmatprep.subr.bf16.mxu1 %v6440_v56  ;;  %v6506_v56 = vld [vmem:[%s8806_s3 + $0xd4c] ss:$76 sps:$4 sm:$0xff]  }
 0x24d   :  { %4530 = vmatpush1.bf16.msra.mxu0 %v6435_v57 }
 0x24e   :  { %4612 = vmatpush1.bf16.msra.mxu1 %v6438_v58  ;;  %4531 = vmatprep.subr.bf16.mxu0 %v6443_v59 }
 0x24f   :  { %4613 = vmatprep.subr.bf16.mxu1 %v6446_v60 }
 0x251   :  { %4532 = vmatpush1.bf16.msra.mxu0 %v6441_v61 }
 0x252   :  { %4614 = vmatpush1.bf16.msra.mxu1 %v6444_v62  ;;  %4533 = vmatprep.subr.bf16.mxu0 %v6449_v63 }
 0x253   :  { %4615 = vmatprep.subr.bf16.mxu1 %v6452_v0  ;;  %v6504_v0 = vld [vmem:[%s8806_s3 + $0xd48] ss:$76 sps:$4 sm:$0xff]  }
 0x255   :  { %4534 = vmatpush1.bf16.msra.mxu0 %v6447_v1  ;;  %v6509_v1 = vld [vmem:[%s8806_s3 + $0xddc] ss:$76 sps:$4 sm:$0xff]  }
 0x256   :  { %4616 = vmatpush1.bf16.msra.mxu1 %v6450_v2  ;;  %4535 = vmatprep.subr.bf16.mxu0 %v6455_v3 }
 0x257   :  { %4617 = vmatprep.subr.bf16.mxu1 %v6458_v4 }
 0x259   :  { %4536 = vmatpush1.bf16.msra.mxu0 %v6453_v5 }
 0x25a   :  { %4618 = vmatpush1.bf16.msra.mxu1 %v6456_v6  ;;  %4537 = vmatprep.subr.bf16.mxu0 %v6461_v7  ;;  %v6512_v6 = vld [vmem:[%s8806_s3 + $0xde4] ss:$76 sps:$4 sm:$0xff]  }
 0x25b   :  { %4619 = vmatprep.subr.bf16.mxu1 %v6464_v8 }
 0x25d   :  { %4538 = vmatpush1.bf16.msra.mxu0 %v6459_v13 }
 0x25e   :  { %4620 = vmatpush1.bf16.msra.mxu1 %v6462_v14  ;;  %4548 = vmatprep.subr.bf16.mxu0 %v6467_v16  ;;  %v6507_v16 = vld [vmem:[%s8806_s3 + $0xdd8] ss:$76 sps:$4 sm:$0xff]  }
 0x25f   :  { %4630 = vmatprep.subr.bf16.mxu1 %v6470_v17  ;;  %v6510_v17 = vld [vmem:[%s8806_s3 + $0xde0] ss:$76 sps:$4 sm:$0xff]  }
 0x260   :  { %4540 = vmatmul.mubr.bf16.vlgmr.msra.gmra.mrb[12].mxu0 %v7050_v31 }
 0x261   :  { %4622 = vmatmul.mubr.bf16.vlgmr.msra.gmra.mrb[16].mxu1 %v7050_v31  ;;  %4549 = vmatpush1.bf16.msra.mxu0 %v6465_v18  ;;  %v6515_v18 = vld [vmem:[%s8806_s3 + $0xe74] ss:$76 sps:$4 sm:$0xff]  }
 0x262   :  { %4580 = vmatprep.mubr.bf16.mxu0 %v7068_v37  ;;  %4631 = vmatpush1.bf16.msra.mxu1 %v6468_v19  ;;  %v6518_v19 = vld [vmem:[%s8806_s3 + $0xe7c] ss:$76 sps:$4 sm:$0xff]  }
 0x263   :  { %4662 = vmatprep.mubr.bf16.mxu1 %v7068_v37  ;;  %4550 = vmatprep.subr.bf16.mxu0 %v6473_v20  ;;  %v6513_v20 = vld [vmem:[%s8806_s3 + $0xe70] ss:$76 sps:$4 sm:$0xff]  }
 0x264   :  { %4632 = vmatprep.subr.bf16.mxu1 %v6476_v22  ;;  %v6516_v22 = vld [vmem:[%s8806_s3 + $0xe78] ss:$76 sps:$4 sm:$0xff]  }
 0x265   :  { %4551 = vmatpush1.bf16.msra.mxu0 %v6471_v23  ;;  %v6521_v23 = vld [vmem:[%s8806_s3 + $0xf0c] ss:$76 sps:$4 sm:$0xff]  }
 0x266   :  { %4633 = vmatpush1.bf16.msra.mxu1 %v6474_v24  ;;  %4552 = vmatprep.subr.bf16.mxu0 %v6479_v26  ;;  %v6524_v24 = vld [vmem:[%s8806_s3 + $0xf14] ss:$76 sps:$4 sm:$0xff]  }
 0x267   :  { %4634 = vmatprep.subr.bf16.mxu1 %v6482_v27  ;;  %v6519_v26 = vld [vmem:[%s8806_s3 + $0xf08] ss:$76 sps:$4 sm:$0xff]  }
 0x269   :  { %4553 = vmatpush1.bf16.msra.mxu0 %v6477_v28  ;;  %v6522_v28 = vld [vmem:[%s8806_s3 + $0xf10] ss:$76 sps:$4 sm:$0xff]  }
 0x26a   :  { %4635 = vmatpush1.bf16.msra.mxu1 %v6480_v32  ;;  %4554 = vmatprep.subr.bf16.mxu0 %v6485_v10  ;;  %v6527_v32 = vld [vmem:[%s8806_s3 + $0xfa4] ss:$76 sps:$4 sm:$0xff]  }
 0x26b   :  { %4636 = vmatprep.subr.bf16.mxu1 %v6488_v33 }
 0x26d   :  { %4555 = vmatpush1.bf16.msra.mxu0 %v6483_v34  ;;  %v6530_v34 = vld [vmem:[%s8806_s3 + $0xfac] ss:$76 sps:$4 sm:$0xff]  }
 0x26e   :  { %4637 = vmatpush1.bf16.msra.mxu1 %v6486_v35  ;;  %4556 = vmatprep.subr.bf16.mxu0 %v6491_v36 }
 0x26f   :  { %4638 = vmatprep.subr.bf16.mxu1 %v6494_v25 }
 0x271   :  { %4557 = vmatpush1.bf16.msra.mxu0 %v6489_v39 }
 0x272   :  { %4639 = vmatpush1.bf16.msra.mxu1 %v6492_v43  ;;  %4558 = vmatprep.subr.bf16.mxu0 %v6497_v45  ;;  %v6525_v43 = vld [vmem:[%s8806_s3 + $0xfa0] ss:$76 sps:$4 sm:$0xff]  }
 0x273   :  { %v4254_v55 = vpop.f32.mrb[4].mxu0  ;;  %4640 = vmatprep.subr.bf16.mxu1 %v6500_v47  ;;  %v6528_v47 = vld [vmem:[%s8806_s3 + $0xfa8] ss:$76 sps:$4 sm:$0xff]  }
 0x274   :  { %v5741_v57 = vadd.f32 %v4254_v55, %v867_v48  ;;  %v4336_v58 = vpop.f32.mrb[8].mxu1  ;;  %v4256_v59 = vpop.f32.mrb[5].mxu0  ;;  %v6533_v48 = vld [vmem:[%s8806_s3 + $0x103c] ss:$76 sps:$4 sm:$0xff]   ;;  %v6540_v55 = vld [vmem:[%s8806_s3 + $0x10d8] ss:$76 sps:$4 sm:$0xff]  }
 0x275   :  { %v5743_v60 = vadd.f32 %v4336_v58, %v875_v49  ;;  %v5742_v61 = vadd.f32 %v4256_v59, %v871_v50  ;;  %v4338_v62 = vpop.f32.mrb[9].mxu1  ;;  %v4258_v63 = vpop.f32.mrb[6].mxu0  ;;  %4559 = vmatpush1.bf16.msra.mxu0 %v6495_v51  ;;  %v6536_v49 = vld [vmem:[%s8806_s3 + $0x1044] ss:$76 sps:$4 sm:$0xff]   ;;  %v6534_v51 = vld [vmem:[%s8806_s3 + $0x1040] ss:$76 sps:$4 sm:$0xff]  }
 0x276   :  { %v5678_v2 = vmul.f32 -1.442695, %v5741_v57  ;;  %v5744_v3 = vadd.f32 %v4338_v62, %v879_v52  ;;  %v4340_v4 = vpop.f32.mrb[10].mxu1  ;;  %4641 = vmatpush1.bf16.msra.mxu1 %v6498_v53  ;;  %v4259_v5 = vpop.f32.mrb[7].mxu0  ;;  %4560 = vmatprep.subr.bf16.mxu0 %v6503_v54  ;;  %v6531_v50 = vld [vmem:[%s8806_s3 + $0x1038] ss:$76 sps:$4 sm:$0xff]  }
 0x277   :  { %v5680_v7 = vmul.f32 -1.442695, %v5743_v60  ;;  %v5679_v8 = vmul.f32 -1.442695, %v5742_v61  ;;  %v4341_v13 = vpop.f32.mrb[11].mxu1  ;;  %4642 = vmatprep.subr.bf16.mxu1 %v6506_v56 }
 0x278   :  { %6705 = vpow2.f32 %v5678_v2  ;;  %v5681_v14 = vmul.f32 -1.442695, %v5744_v3  ;;  %v6539_v52 = vld [vmem:[%s8806_s3 + $0x10d4] ss:$76 sps:$4 sm:$0xff]   ;;  %v6542_v53 = vld [vmem:[%s8806_s3 + $0x10dc] ss:$76 sps:$4 sm:$0xff]  }
 0x279   :  { %6707 = vpow2.f32 %v5680_v7  ;;  %4561 = vmatpush1.bf16.msra.mxu0 %v6501_v30  ;;  %v6537_v54 = vld [vmem:[%s8806_s3 + $0x10d0] ss:$76 sps:$4 sm:$0xff]   ;;  %v6545_v56 = vld [vmem:[%s8806_s3 + $0x116c] ss:$76 sps:$4 sm:$0xff]   ;;  %v6548_v58 = vld [vmem:[%s8806_s3 + $0x1174] ss:$76 sps:$4 sm:$0xff]  }
 0x27a   :  { %6709 = vpow2.f32 %v5679_v8  ;;  %4643 = vmatpush1.bf16.msra.mxu1 %v6504_v0  ;;  %4562 = vmatprep.subr.bf16.mxu0 %v6509_v1  ;;  %v6543_v60 = vld [vmem:[%s8806_s3 + $0x1168] ss:$76 sps:$4 sm:$0xff]   ;;  %v6546_v63 = vld [vmem:[%s8806_s3 + $0x1170] ss:$76 sps:$4 sm:$0xff]   ;;  %v6554_v2 = vld [vmem:[%s8806_s3 + $0x120c] ss:$76 sps:$4 sm:$0xff]  }
 0x27b   :  { %6711 = vpow2.f32 %v5681_v14  ;;  %4644 = vmatprep.subr.bf16.mxu1 %v6512_v6  ;;  %v6551_v0 = vld [vmem:[%s8806_s3 + $0x1204] ss:$76 sps:$4 sm:$0xff]   ;;  %v6549_v5 = vld [vmem:[%s8806_s3 + $0x1200] ss:$76 sps:$4 sm:$0xff]   ;;  %v6552_v6 = vld [vmem:[%s8806_s3 + $0x1208] ss:$76 sps:$4 sm:$0xff]  }
 0x27c   :  { %v6557_v7 = vld [vmem:[%s8806_s3 + $0x129c] ss:$76 sps:$4 sm:$0xff]   ;;  %v6560_v13 = vld [vmem:[%s8806_s3 + $0x12a4] ss:$76 sps:$4 sm:$0xff]  }
 0x27d   :  { %4563 = vmatpush1.bf16.msra.mxu0 %v6507_v16  ;;  %v6555_v14 = vld [vmem:[%s8806_s3 + $0x1298] ss:$76 sps:$4 sm:$0xff]   ;;  %v6558_v16 = vld [vmem:[%s8806_s3 + $0x12a0] ss:$76 sps:$4 sm:$0xff]  }
 0x27e   :  { %4645 = vmatpush1.bf16.msra.mxu1 %v6510_v17  ;;  %4564 = vmatprep.subr.bf16.mxu0 %v6515_v18  ;;  %v6563_v17 = vld [vmem:[%s8806_s3 + $0x44] ss:$76 sps:$4 sm:$0xff]   ;;  %v6564_v18 = vld [vmem:[%s8806_s3 + $0x508] ss:$76 sps:$4 sm:$0xff]  }
 0x27f   :  { %4646 = vmatprep.subr.bf16.mxu1 %v6518_v19  ;;  %v6561_v19 = vld [vmem:[%s8806_s3 + $0x40] ss:$76 sps:$4 sm:$0xff]  }
 0x281   :  { %4565 = vmatpush1.bf16.msra.mxu0 %v6513_v20  ;;  %v6565_v20 = vld [vmem:[%s8806_s3 + $0x48] ss:$76 sps:$4 sm:$0xff]  }
 0x282   :  { %v6706_v27 = vpop.eup %6705  ;;  %4647 = vmatpush1.bf16.msra.mxu1 %v6516_v22  ;;  %4566 = vmatprep.subr.bf16.mxu0 %v6521_v23  ;;  %v6568_v22 = vld [vmem:[%s8806_s3 + $0xdc] ss:$76 sps:$4 sm:$0xff]   ;;  %v6569_v23 = vld [vmem:[%s8806_s3 + $0x5a0] ss:$76 sps:$4 sm:$0xff]  }
 0x283   :  { %v6708_v10 = vpop.eup %6707  ;;  %v4894_v33 = vadd.f32 1.0, %v6706_v27  ;;  %4648 = vmatprep.subr.bf16.mxu1 %v6524_v24  ;;  %v6566_v24 = vld [vmem:[%s8806_s3 + $0xd8] ss:$76 sps:$4 sm:$0xff]   ;;  %v6573_v27 = vld [vmem:[%s8806_s3 + $0x174] ss:$76 sps:$4 sm:$0xff]  }
 0x284   :  { %v6710_v35 = vpop.eup %6709  ;;  %v4896_v36 = vadd.f32 1.0, %v6708_v10  ;;  %v6575_v10 = vld [vmem:[%s8806_s3 + $0x178] ss:$76 sps:$4 sm:$0xff]  }
 0x285   :  { %v6712_v25 = vpop.eup %6711  ;;  %6713 = vrcp.f32 %v4894_v33  ;;  %v4895_v39 = vadd.f32 1.0, %v6710_v35  ;;  %4567 = vmatpush1.bf16.msra.mxu0 %v6519_v26  ;;  %v6570_v26 = vld [vmem:[%s8806_s3 + $0xe0] ss:$76 sps:$4 sm:$0xff]   ;;  %v6579_v33 = vld [vmem:[%s8806_s3 + $0x6d0] ss:$76 sps:$4 sm:$0xff]  }
 0x286   :  { %6715 = vrcp.f32 %v4896_v36  ;;  %v4897_v45 = vadd.f32 1.0, %v6712_v25  ;;  %4649 = vmatpush1.bf16.msra.mxu1 %v6522_v28  ;;  %4568 = vmatprep.subr.bf16.mxu0 %v6527_v32  ;;  %v6574_v28 = vld [vmem:[%s8806_s3 + $0x638] ss:$76 sps:$4 sm:$0xff]   ;;  %v6571_v32 = vld [vmem:[%s8806_s3 + $0x170] ss:$76 sps:$4 sm:$0xff]  }
 0x287   :  { %6717 = vrcp.f32 %v4895_v39  ;;  %4650 = vmatprep.subr.bf16.mxu1 %v6530_v34  ;;  %v6576_v34 = vld [vmem:[%s8806_s3 + $0x208] ss:$76 sps:$4 sm:$0xff]   ;;  %v6580_v35 = vld [vmem:[%s8806_s3 + $0x210] ss:$76 sps:$4 sm:$0xff]   ;;  %v6581_v39 = vld [vmem:[%s8806_s3 + $0x2a0] ss:$76 sps:$4 sm:$0xff]  }
 0x288   :  { %6719 = vrcp.f32 %v4897_v45  ;;  %v6583_v36 = vld [vmem:[%s8806_s3 + $0x2a4] ss:$76 sps:$4 sm:$0xff]   ;;  %v6584_v25 = vld [vmem:[%s8806_s3 + $0x768] ss:$76 sps:$4 sm:$0xff]  }
 0x289   :  { %4569 = vmatpush1.bf16.msra.mxu0 %v6525_v43  ;;  %v6585_v43 = vld [vmem:[%s8806_s3 + $0x2a8] ss:$76 sps:$4 sm:$0xff]  }
 0x28a   :  { %4651 = vmatpush1.bf16.msra.mxu1 %v6528_v47  ;;  %4570 = vmatprep.subr.bf16.mxu0 %v6533_v48  ;;  %v6588_v45 = vld [vmem:[%s8806_s3 + $0x33c] ss:$76 sps:$4 sm:$0xff]   ;;  %v6589_v47 = vld [vmem:[%s8806_s3 + $0x800] ss:$76 sps:$4 sm:$0xff]   ;;  %v6586_v48 = vld [vmem:[%s8806_s3 + $0x338] ss:$76 sps:$4 sm:$0xff]  }
 0x28b   :  { %4652 = vmatprep.subr.bf16.mxu1 %v6536_v49  ;;  %v6590_v49 = vld [vmem:[%s8806_s3 + $0x340] ss:$76 sps:$4 sm:$0xff]  }
 0x28d   :  { %4571 = vmatpush1.bf16.msra.mxu0 %v6531_v50  ;;  %v6593_v50 = vld [vmem:[%s8806_s3 + $0x3d4] ss:$76 sps:$4 sm:$0xff]  }
 0x28e   :  { %4653 = vmatpush1.bf16.msra.mxu1 %v6534_v51  ;;  %4572 = vmatprep.subr.bf16.mxu0 %v6539_v52  ;;  %v6594_v51 = vld [vmem:[%s8806_s3 + $0x898] ss:$76 sps:$4 sm:$0xff]   ;;  %v6591_v52 = vld [vmem:[%s8806_s3 + $0x3d0] ss:$76 sps:$4 sm:$0xff]  }
 0x28f   :  { %v6714_v57 = vpop.eup %6713  ;;  %4654 = vmatprep.subr.bf16.mxu1 %v6542_v53  ;;  %v6595_v53 = vld [vmem:[%s8806_s3 + $0x3d8] ss:$76 sps:$4 sm:$0xff]  }
 0x290   :  { %v6716_v59 = vpop.eup %6715 }
 0x291   :  { %v6718_v30 = vpop.eup %6717  ;;  %4573 = vmatpush1.bf16.msra.mxu0 %v6537_v54  ;;  %v6598_v54 = vld [vmem:[%s8806_s3 + $0x46c] ss:$76 sps:$4 sm:$0xff]  }
 0x292   :  { %v6720_v61 = vpop.eup %6719  ;;  %v4983_v62 = vcombine.low %v6714_v57, %v6718_v30  ;;  %4655 = vmatpush1.bf16.msra.mxu1 %v6540_v55  ;;  %4574 = vmatprep.subr.bf16.mxu0 %v6545_v56  ;;  %v6599_v55 = vld [vmem:[%s8806_s3 + $0x930] ss:$76 sps:$4 sm:$0xff]   ;;  %v6596_v56 = vld [vmem:[%s8806_s3 + $0x468] ss:$76 sps:$4 sm:$0xff]   ;;  %v6601_v30 = vld [vmem:[%s8806_s3 + $0x500] ss:$76 sps:$4 sm:$0xff]  }
 0x293   :  { %v4984_v1 = vcombine.low %v6716_v59, %v6720_v61  ;;  %4656 = vmatprep.subr.bf16.mxu1 %v6548_v58  ;;  %v6600_v57 = vld [vmem:[%s8806_s3 + $0x470] ss:$76 sps:$4 sm:$0xff]   ;;  %v6604_v59 = vld [vmem:[%s8806_s3 + $0xe88] ss:$76 sps:$4 sm:$0xff]  }
 0x294   :  { %v4991_v3 = vrot.slane %v4983_v62, %v8010_v46  ;;  %v6603_v58 = vld [vmem:[%s8806_s3 + $0x504] ss:$76 sps:$4 sm:$0xff]   ;;  %v6608_v61 = vld [vmem:[%s8806_s3 + $0x59c] ss:$76 sps:$4 sm:$0xff]   ;;  %v6609_v62 = vld [vmem:[%s8806_s3 + $0xf20] ss:$76 sps:$4 sm:$0xff]  }
 0x295   :  { %v4998_v4 = vrot.slane %v4984_v1, %v8010_v46  ;;  %4575 = vmatpush1.bf16.msra.mxu0 %v6543_v60  ;;  %v6605_v60 = vld [vmem:[%s8806_s3 + $0x9c8] ss:$76 sps:$4 sm:$0xff]  }
 0x296   :  { %4657 = vmatpush1.bf16.msra.mxu1 %v6546_v63  ;;  %4576 = vmatprep.subr.bf16.mxu0 %v6551_v0  ;;  %v6606_v63 = vld [vmem:[%s8806_s3 + $0x598] ss:$76 sps:$4 sm:$0xff]   ;;  %v6610_v0 = vld [vmem:[%s8806_s3 + $0xa60] ss:$76 sps:$4 sm:$0xff]  }
 0x297   :  { %v4999_v8 = vcombine.low %v4991_v3, %v4998_v4  ;;  %4658 = vmatprep.subr.bf16.mxu1 %v6554_v2  ;;  %v6613_v1 = vld [vmem:[%s8806_s3 + $0x634] ss:$76 sps:$4 sm:$0xff]   ;;  %v6614_v2 = vld [vmem:[%s8806_s3 + $0xfb8] ss:$76 sps:$4 sm:$0xff]   ;;  %v6611_v3 = vld [vmem:[%s8806_s3 + $0x630] ss:$76 sps:$4 sm:$0xff]  }
 0x298   :  { %v6615_v4 = vld [vmem:[%s8806_s3 + $0xaf8] ss:$76 sps:$4 sm:$0xff]  }
 0x299   :  { %5056 = vst [vmem:[%s8809_s5 + $0x8] sm:$0xff] %v4999_v8  ;;  %4577 = vmatpush1.bf16.msra.mxu0 %v6549_v5  ;;  %v6618_v5 = vld [vmem:[%s8806_s3 + $0x6cc] ss:$76 sps:$4 sm:$0xff]   ;;  %v6620_v8 = vld [vmem:[%s8806_s3 + $0xb90] ss:$76 sps:$4 sm:$0xff]  }
 0x29a   :  { %4659 = vmatpush1.bf16.msra.mxu1 %v6552_v6  ;;  %4578 = vmatprep.subr.bf16.mxu0 %v6557_v7  ;;  %v6619_v6 = vld [vmem:[%s8806_s3 + $0x1050] ss:$76 sps:$4 sm:$0xff]   ;;  %v6616_v7 = vld [vmem:[%s8806_s3 + $0x6c8] ss:$76 sps:$4 sm:$0xff]  }
 0x29b   :  { %4660 = vmatprep.subr.bf16.mxu1 %v6560_v13  ;;  %v6623_v13 = vld [vmem:[%s8806_s3 + $0x764] ss:$76 sps:$4 sm:$0xff]  }
 0x29d   :  { %4579 = vmatpush1.bf16.msra.mxu0 %v6555_v14  ;;  %v6624_v14 = vld [vmem:[%s8806_s3 + $0x10e8] ss:$76 sps:$4 sm:$0xff]  }
 0x29e   :  { %4661 = vmatpush1.bf16.msra.mxu1 %v6558_v16  ;;  %4671 = vmatprep.subr.bf16.mxu0 %v6563_v17  ;;  %v6621_v16 = vld [vmem:[%s8806_s3 + $0x760] ss:$76 sps:$4 sm:$0xff]   ;;  %v6625_v17 = vld [vmem:[%s8806_s3 + $0xc28] ss:$76 sps:$4 sm:$0xff]  }
 0x29f   :  { %5693 = vmatprep.subr.bf16.mxu1 %v6564_v18  ;;  %v6628_v18 = vld [vmem:[%s8806_s3 + $0x7fc] ss:$76 sps:$4 sm:$0xff]  }
 0x2a0   :  { %4581 = vmatmul.mubr.bf16.vlgmr.msra.gmra.mrb[12].mxu0 %v7249_v42 }
 0x2a1   :  { %4663 = vmatmul.mubr.bf16.vlgmr.msra.gmra.mrb[16].mxu1 %v7249_v42  ;;  %4672 = vmatpush1.bf16.msra.mxu0 %v6561_v19  ;;  %v6629_v19 = vld [vmem:[%s8806_s3 + $0x1180] ss:$76 sps:$4 sm:$0xff]  }
 0x2a2   :  { %4703 = vmatprep.mubr.bf16.mxu0 %v7048_v29  ;;  %5694 = vmatpush3.bf16.msra.mxu1 %v6565_v20  ;;  %v6626_v20 = vld [vmem:[%s8806_s3 + $0x7f8] ss:$76 sps:$4 sm:$0xff]  }
 0x2a3   :  { %4785 = vmatprep.mubr.bf16.mxu1 %v7048_v29  ;;  %4673 = vmatprep.subr.bf16.mxu0 %v6568_v22  ;;  %v6578_v29 = vld [vmem:[%s8806_s3 + $0x20c] ss:$76 sps:$4 sm:$0xff]  }
 0x2a4   :  { %5695 = vmatprep.subr.bf16.mxu1 %v6569_v23  ;;  %v6630_v22 = vld [vmem:[%s8806_s3 + $0xcc0] ss:$76 sps:$4 sm:$0xff]  }
 0x2a5   :  { %4674 = vmatpush1.bf16.msra.mxu0 %v6566_v24  ;;  %v6633_v23 = vld [vmem:[%s8806_s3 + $0x894] ss:$76 sps:$4 sm:$0xff]   ;;  %v6634_v24 = vld [vmem:[%s8806_s3 + $0x1218] ss:$76 sps:$4 sm:$0xff]  }
 0x2a6   :  { %5696 = vmatpush3.bf16.msra.mxu1 %v6570_v26  ;;  %4675 = vmatprep.subr.bf16.mxu0 %v6573_v27  ;;  %v6631_v26 = vld [vmem:[%s8806_s3 + $0x890] ss:$76 sps:$4 sm:$0xff]   ;;  %v6635_v27 = vld [vmem:[%s8806_s3 + $0xd58] ss:$76 sps:$4 sm:$0xff]  }
 0x2a7   :  { %5697 = vmatprep.subr.bf16.mxu1 %v6574_v28  ;;  %v6638_v28 = vld [vmem:[%s8806_s3 + $0x92c] ss:$76 sps:$4 sm:$0xff]  }
 0x2a9   :  { %4676 = vmatpush1.bf16.msra.mxu0 %v6571_v32  ;;  %v6639_v32 = vld [vmem:[%s8806_s3 + $0x12b0] ss:$76 sps:$4 sm:$0xff]  }
 0x2aa   :  { %5698 = vmatpush3.bf16.msra.mxu1 %v6575_v10  ;;  %4677 = vmatprep.subr.bf16.mxu0 %v6578_v29  ;;  %v6636_v10 = vld [vmem:[%s8806_s3 + $0x928] ss:$76 sps:$4 sm:$0xff]   ;;  %v6640_v29 = vld [vmem:[%s8806_s3 + $0xdf0] ss:$76 sps:$4 sm:$0xff]  }
 0x2ab   :  { %5699 = vmatprep.subr.bf16.mxu1 %v6579_v33  ;;  %v6643_v33 = vld [vmem:[%s8806_s3 + $0x9c4] ss:$76 sps:$4 sm:$0xff]  }
 0x2ad   :  { %4678 = vmatpush1.bf16.msra.mxu0 %v6576_v34  ;;  %v6641_v34 = vld [vmem:[%s8806_s3 + $0x9c0] ss:$76 sps:$4 sm:$0xff]  }
 0x2ae   :  { %5700 = vmatpush3.bf16.msra.mxu1 %v6580_v35  ;;  %4679 = vmatprep.subr.bf16.mxu0 %v6583_v36  ;;  %v6646_v35 = vld [vmem:[%s8806_s3 + $0xa5c] ss:$76 sps:$4 sm:$0xff]   ;;  %v6644_v36 = vld [vmem:[%s8806_s3 + $0xa58] ss:$76 sps:$4 sm:$0xff]  }
 0x2af   :  { %5701 = vmatprep.subr.bf16.mxu1 %v6584_v25  ;;  %v6649_v25 = vld [vmem:[%s8806_s3 + $0xaf4] ss:$76 sps:$4 sm:$0xff]  }
 0x2b1   :  { %4680 = vmatpush1.bf16.msra.mxu0 %v6581_v39  ;;  %v6647_v39 = vld [vmem:[%s8806_s3 + $0xaf0] ss:$76 sps:$4 sm:$0xff]  }
 0x2b2   :  { %5702 = vmatpush3.bf16.msra.mxu1 %v6585_v43  ;;  %4681 = vmatprep.subr.bf16.mxu0 %v6588_v45  ;;  %v6655_v43 = vld [vmem:[%s8806_s3 + $0xc24] ss:$76 sps:$4 sm:$0xff]   ;;  %v6653_v45 = vld [vmem:[%s8806_s3 + $0xc20] ss:$76 sps:$4 sm:$0xff]  }
 0x2b3   :  { %5703 = vmatprep.subr.bf16.mxu1 %v6589_v47  ;;  %v8694_v47 = vld [vmem:[%s8808_s4 + $0x8] sm:$0xff] }
 0x2b5   :  { %4682 = vmatpush1.bf16.msra.mxu0 %v6586_v48  ;;  %v6658_v48 = vld [vmem:[%s8806_s3 + $0xcbc] ss:$76 sps:$4 sm:$0xff]  }
 0x2b6   :  { %5704 = vmatpush3.bf16.msra.mxu1 %v6590_v49  ;;  %4683 = vmatprep.subr.bf16.mxu0 %v6593_v50  ;;  %v883_v49 = vrot.slane %v8694_v47, %v7020_v11  ;;  %v891_v50 = vrot.slane %v8694_v47, %v7199_v21 }
 0x2b7   :  { %5705 = vmatprep.subr.bf16.mxu1 %v6594_v51  ;;  %v887_v51 = vrot.slane %v8694_v47, %v7023_v12 }
 0x2b9   :  { %4684 = vmatpush1.bf16.msra.mxu0 %v6591_v52  ;;  %v6656_v52 = vld [vmem:[%s8806_s3 + $0xcb8] ss:$76 sps:$4 sm:$0xff]  }
 0x2ba   :  { %5706 = vmatpush3.bf16.msra.mxu1 %v6595_v53  ;;  %4685 = vmatprep.subr.bf16.mxu0 %v6598_v54  ;;  %v895_v53 = vrot.slane %v8694_v47, %v7030_v15  ;;  %v6661_v54 = vld [vmem:[%s8806_s3 + $0xd54] ss:$76 sps:$4 sm:$0xff]  }
 0x2bb   :  { %5707 = vmatprep.subr.bf16.mxu1 %v6599_v55 }
 0x2bd   :  { %4686 = vmatpush1.bf16.msra.mxu0 %v6596_v56 }
 0x2be   :  { %5708 = vmatpush3.bf16.msra.mxu1 %v6600_v57  ;;  %4687 = vmatprep.subr.bf16.mxu0 %v6603_v58 }
 0x2bf   :  { %5715 = vmatprep.subr.bf16.mxu1 %v6604_v59 }
 0x2c1   :  { %4786 = vmatmul.mubr.bf16.vlgmr.msra.gmra.mrb[20].mxu1 %v7050_v31  ;;  %4688 = vmatpush1.bf16.msra.mxu0 %v6601_v30 }
 0x2c2   :  { %5716 = vmatpush3.bf16.msra.mxu1 %v6605_v60  ;;  %4825 = vmatprep.mubr.bf16.mxu1 %v7068_v37 }
 0x2c3   :  { %4689 = vmatprep.subr.bf16.mxu0 %v6608_v61  ;;  %5717 = vmatprep.subr.bf16.mxu1 %v6609_v62  ;;  %v6659_v62 = vld [vmem:[%s8806_s3 + $0xd50] ss:$76 sps:$4 sm:$0xff]  }
 0x2c5   :  { %4690 = vmatpush1.bf16.msra.mxu0 %v6606_v63 }
 0x2c6   :  { %5718 = vmatpush3.bf16.msra.mxu1 %v6610_v0  ;;  %4691 = vmatprep.subr.bf16.mxu0 %v6613_v1 }
 0x2c7   :  { %5719 = vmatprep.subr.bf16.mxu1 %v6614_v2  ;;  %v6664_v2 = vld [vmem:[%s8806_s3 + $0xdec] ss:$76 sps:$4 sm:$0xff]  }
 0x2c9   :  { %4692 = vmatpush1.bf16.msra.mxu0 %v6611_v3 }
 0x2ca   :  { %5720 = vmatpush3.bf16.msra.mxu1 %v6615_v4  ;;  %4693 = vmatprep.subr.bf16.mxu0 %v6618_v5 }
 0x2cb   :  { %5721 = vmatprep.subr.bf16.mxu1 %v6619_v6 }
 0x2cd   :  { %4694 = vmatpush1.bf16.msra.mxu0 %v6616_v7  ;;  %v6662_v7 = vld [vmem:[%s8806_s3 + $0xde8] ss:$76 sps:$4 sm:$0xff]  }
 0x2ce   :  { %5722 = vmatpush3.bf16.msra.mxu1 %v6620_v8  ;;  %4695 = vmatprep.subr.bf16.mxu0 %v6623_v13  ;;  %v6667_v8 = vld [vmem:[%s8806_s3 + $0xe84] ss:$76 sps:$4 sm:$0xff]   ;;  %v6665_v13 = vld [vmem:[%s8806_s3 + $0xe80] ss:$76 sps:$4 sm:$0xff]  }
 0x2cf   :  { %5723 = vmatprep.subr.bf16.mxu1 %v6624_v14  ;;  %v6670_v14 = vld [vmem:[%s8806_s3 + $0xf1c] ss:$76 sps:$4 sm:$0xff]  }
 0x2d1   :  { %4696 = vmatpush1.bf16.msra.mxu0 %v6621_v16  ;;  %v6668_v16 = vld [vmem:[%s8806_s3 + $0xf18] ss:$76 sps:$4 sm:$0xff]  }
 0x2d2   :  { %5724 = vmatpush3.bf16.msra.mxu1 %v6625_v17  ;;  %4697 = vmatprep.subr.bf16.mxu0 %v6628_v18  ;;  %v6673_v18 = vld [vmem:[%s8806_s3 + $0xfb4] ss:$76 sps:$4 sm:$0xff]  }
 0x2d3   :  { %5725 = vmatprep.subr.bf16.mxu1 %v6629_v19 }
 0x2d5   :  { %4698 = vmatpush1.bf16.msra.mxu0 %v6626_v20 }
 0x2d6   :  { %5726 = vmatpush3.bf16.msra.mxu1 %v6630_v22  ;;  %4699 = vmatprep.subr.bf16.mxu0 %v6633_v23 }
 0x2d7   :  { %5727 = vmatprep.subr.bf16.mxu1 %v6634_v24 }
 0x2d9   :  { %4700 = vmatpush1.bf16.msra.mxu0 %v6631_v26 }
 0x2da   :  { %5728 = vmatpush3.bf16.msra.mxu1 %v6635_v27  ;;  %4701 = vmatprep.subr.bf16.mxu0 %v6638_v28  ;;  %v6671_v27 = vld [vmem:[%s8806_s3 + $0xfb0] ss:$76 sps:$4 sm:$0xff]  }
 0x2db   :  { %5729 = vmatprep.subr.bf16.mxu1 %v6639_v32  ;;  %v6676_v32 = vld [vmem:[%s8806_s3 + $0x104c] ss:$76 sps:$4 sm:$0xff]  }
 0x2dd   :  { %4702 = vmatpush1.bf16.msra.mxu0 %v6636_v10  ;;  %v6674_v10 = vld [vmem:[%s8806_s3 + $0x1048] ss:$76 sps:$4 sm:$0xff]  }
 0x2de   :  { %5730 = vmatpush3.bf16.msra.mxu1 %v6640_v29  ;;  %4712 = vmatprep.subr.bf16.mxu0 %v6643_v33  ;;  %v6679_v29 = vld [vmem:[%s8806_s3 + $0x10e4] ss:$76 sps:$4 sm:$0xff]   ;;  %v6677_v33 = vld [vmem:[%s8806_s3 + $0x10e0] ss:$76 sps:$4 sm:$0xff]  }
 0x2e0   :  { %4704 = vmatmul.mubr.bf16.vlgmr.msra.gmra.mrb[16].mxu0 %v7050_v31  ;;  %v6652_v31 = vld [vmem:[%s8806_s3 + $0xb8c] ss:$76 sps:$4 sm:$0xff]  }
 0x2e1   :  { %4826 = vmatmul.mubr.bf16.vlgmr.msra.gmra.mrb[24].mxu1 %v7249_v42  ;;  %4713 = vmatpush1.bf16.msra.mxu0 %v6641_v34  ;;  %v6682_v34 = vld [vmem:[%s8806_s3 + $0x117c] ss:$76 sps:$4 sm:$0xff]  }
 0x2e2   :  { %4744 = vmatprep.mubr.bf16.mxu0 %v7068_v37  ;;  %4714 = vmatprep.subr.bf16.mxu0 %v6646_v35  ;;  %v6650_v37 = vld [vmem:[%s8806_s3 + $0xb88] ss:$76 sps:$4 sm:$0xff]  }
 0x2e5   :  { %4715 = vmatpush1.bf16.msra.mxu0 %v6644_v36 }
 0x2e6   :  { %4716 = vmatprep.subr.bf16.mxu0 %v6649_v25 }
 0x2e9   :  { %4717 = vmatpush1.bf16.msra.mxu0 %v6647_v39  ;;  %v6680_v39 = vld [vmem:[%s8806_s3 + $0x1178] ss:$76 sps:$4 sm:$0xff]  }
 0x2ea   :  { %4718 = vmatprep.subr.bf16.mxu0 %v6652_v31 }
 0x2ed   :  { %4719 = vmatpush1.bf16.msra.mxu0 %v6650_v37 }
 0x2ee   :  { %4720 = vmatprep.subr.bf16.mxu0 %v6655_v43  ;;  %v6685_v43 = vld [vmem:[%s8806_s3 + $0x1214] ss:$76 sps:$4 sm:$0xff]  }
 0x2f1   :  { %4721 = vmatpush1.bf16.msra.mxu0 %v6653_v45 }
 0x2f2   :  { %4722 = vmatprep.subr.bf16.mxu0 %v6658_v48 }
 0x2f3   :  { %v4418_v55 = vpop.f32.mrb[8].mxu0 }
 0x2f4   :  { %v5745_v56 = vadd.f32 %v4418_v55, %v883_v49  ;;  %v4500_v57 = vpop.f32.mrb[12].mxu1  ;;  %v4420_v58 = vpop.f32.mrb[9].mxu0  ;;  %v907_v55 = vrot.slane %v8694_v47, %v874_v40 }
 0x2f5   :  { %v5747_v59 = vadd.f32 %v4500_v57, %v891_v50  ;;  %v5746_v30 = vadd.f32 %v4420_v58, %v887_v51  ;;  %v4502_v60 = vpop.f32.mrb[13].mxu1  ;;  %v4422_v61 = vpop.f32.mrb[10].mxu0  ;;  %4723 = vmatpush1.bf16.msra.mxu0 %v6656_v52  ;;  %v6683_v50 = vld [vmem:[%s8806_s3 + $0x1210] ss:$76 sps:$4 sm:$0xff]   ;;  %v6688_v51 = vld [vmem:[%s8806_s3 + $0x12ac] ss:$76 sps:$4 sm:$0xff]   ;;  %v911_v57 = vrot.slane %v8694_v47, %v878_v44 }
 0x2f6   :  { %v5682_v63 = vmul.f32 -1.442695, %v5745_v56  ;;  %v5748_v15 = vadd.f32 %v4502_v60, %v895_v53  ;;  %v4504_v0 = vpop.f32.mrb[14].mxu1  ;;  %v4423_v1 = vpop.f32.mrb[11].mxu0  ;;  %4724 = vmatprep.subr.bf16.mxu0 %v6661_v54  ;;  %v6686_v53 = vld [vmem:[%s8806_s3 + $0x12a8] ss:$76 sps:$4 sm:$0xff]   ;;  %v899_v54 = vrot.slane %v8694_v47, %v866_v38  ;;  %v903_v56 = vrot.slane %v8694_v47, %v870_v41 }
 0x2f7   :  { %v5684_v3 = vmul.f32 -1.442695, %v5747_v59  ;;  %v5683_v4 = vmul.f32 -1.442695, %v5746_v30  ;;  %v4505_v5 = vpop.f32.mrb[15].mxu1 }
 0x2f8   :  { %6721 = vpow2.f32 %v5682_v63  ;;  %v5685_v6 = vmul.f32 -1.442695, %v5748_v15 }
 0x2f9   :  { %6723 = vpow2.f32 %v5684_v3  ;;  %4725 = vmatpush1.bf16.msra.mxu0 %v6659_v62 }
 0x2fa   :  { %6725 = vpow2.f32 %v5683_v4  ;;  %4726 = vmatprep.subr.bf16.mxu0 %v6664_v2 }
 0x2fb   :  { %6727 = vpow2.f32 %v5685_v6 }
 0x2fd   :  { %4727 = vmatpush1.bf16.msra.mxu0 %v6662_v7 }
 0x2fe   :  { %4728 = vmatprep.subr.bf16.mxu0 %v6667_v8 }
 0x301   :  { %4729 = vmatpush1.bf16.msra.mxu0 %v6665_v13 }
 0x302   :  { %v6722_v17 = vpop.eup %6721  ;;  %4730 = vmatprep.subr.bf16.mxu0 %v6670_v14 }
 0x303   :  { %v6724_v19 = vpop.eup %6723  ;;  %v4898_v20 = vadd.f32 1.0, %v6722_v17 }
 0x304   :  { %v6726_v22 = vpop.eup %6725  ;;  %v4900_v23 = vadd.f32 1.0, %v6724_v19 }
 0x305   :  { %v6728_v24 = vpop.eup %6727  ;;  %6729 = vrcp.f32 %v4898_v20  ;;  %v4899_v26 = vadd.f32 1.0, %v6726_v22  ;;  %4731 = vmatpush1.bf16.msra.mxu0 %v6668_v16 }
 0x306   :  { %6731 = vrcp.f32 %v4900_v23  ;;  %v4901_v28 = vadd.f32 1.0, %v6728_v24  ;;  %4732 = vmatprep.subr.bf16.mxu0 %v6673_v18 }
 0x307   :  { %6733 = vrcp.f32 %v4899_v26 }
 0x308   :  { %6735 = vrcp.f32 %v4901_v28 }
 0x309   :  { %4733 = vmatpush1.bf16.msra.mxu0 %v6671_v27 }
 0x30a   :  { %4734 = vmatprep.subr.bf16.mxu0 %v6676_v32 }
 0x30d   :  { %4735 = vmatpush1.bf16.msra.mxu0 %v6674_v10  ;;  %v844_v10 = vld [vmem:[%s8808_s4 + $0x10] sm:$0x7] }
 0x30e   :  { %4736 = vmatprep.subr.bf16.mxu0 %v6679_v29  ;;  %v923_v29 = vrot.slane %v844_v10, %v7199_v21 }
 0x30f   :  { %v6730_v35 = vpop.eup %6729 }
 0x310   :  { %v6732_v36 = vpop.eup %6731 }
 0x311   :  { %v6734_v25 = vpop.eup %6733  ;;  %4737 = vmatpush1.bf16.msra.mxu0 %v6677_v33 }
 0x312   :  { %v6736_v31 = vpop.eup %6735  ;;  %v5000_v37 = vcombine.low %v6730_v35, %v6734_v25  ;;  %4738 = vmatprep.subr.bf16.mxu0 %v6682_v34 }
 0x313   :  { %v5001_v45 = vcombine.low %v6732_v36, %v6736_v31 }
 0x314   :  { %v5008_v48 = vrot.slane %v5000_v37, %v8010_v46 }
 0x315   :  { %v5015_v49 = vrot.slane %v5001_v45, %v8010_v46  ;;  %4739 = vmatpush1.bf16.msra.mxu0 %v6680_v39  ;;  %v919_v45 = vrot.slane %v844_v10, %v7023_v12 }
 0x316   :  { %4740 = vmatprep.subr.bf16.mxu0 %v6685_v43  ;;  %v915_v43 = vrot.slane %v844_v10, %v7020_v11 }
 0x317   :  { %v5016_v52 = vcombine.low %v5008_v48, %v5015_v49 }
 0x319   :  { %5057 = vst [vmem:[%s8809_s5 + $0x10] sm:$0xff] %v5016_v52  ;;  %4741 = vmatpush1.bf16.msra.mxu0 %v6683_v50 }
 0x31a   :  { %4742 = vmatprep.subr.bf16.mxu0 %v6688_v51 }
 0x31d   :  { %4743 = vmatpush1.bf16.msra.mxu0 %v6686_v53 }
 0x320   :  { %4745 = vmatmul.mubr.bf16.vlgmr.msra.gmra.mrb[16].mxu0 %v7249_v42 }
 0x373   :  { %v4582_v58 = vpop.f32.mrb[12].mxu0 }
 0x374   :  { %v5749_v59 = vadd.f32 %v4582_v58, %v899_v54  ;;  %v4664_v30 = vpop.f32.mrb[16].mxu1  ;;  %v4584_v42 = vpop.f32.mrb[13].mxu0 }
 0x375   :  { %v5751_v60 = vadd.f32 %v4664_v30, %v907_v55  ;;  %v5750_v61 = vadd.f32 %v4584_v42, %v903_v56  ;;  %v4666_v62 = vpop.f32.mrb[17].mxu1  ;;  %v4586_v38 = vpop.f32.mrb[14].mxu0 }
 0x376   :  { %v5686_v63 = vmul.f32 -1.442695, %v5749_v59  ;;  %v5752_v15 = vadd.f32 %v4666_v62, %v911_v57  ;;  %v4668_v0 = vpop.f32.mrb[18].mxu1  ;;  %v4587_v40 = vpop.f32.mrb[15].mxu0 }
 0x377   :  { %v5688_v1 = vmul.f32 -1.442695, %v5751_v60  ;;  %v5687_v2 = vmul.f32 -1.442695, %v5750_v61  ;;  %v4669_v3 = vpop.f32.mrb[19].mxu1 }
 0x378   :  { %6737 = vpow2.f32 %v5686_v63  ;;  %v5689_v41 = vmul.f32 -1.442695, %v5752_v15 }
 0x379   :  { %6739 = vpow2.f32 %v5688_v1 }
 0x37a   :  { %6741 = vpow2.f32 %v5687_v2 }
 0x37b   :  { %6743 = vpow2.f32 %v5689_v41 }
 0x382   :  { %v6738_v9 = vpop.eup %6737 }
 0x383   :  { %v6740_v44 = vpop.eup %6739  ;;  %v4902_v47 = vadd.f32 1.0, %v6738_v9 }
 0x384   :  { %v6742_v4 = vpop.eup %6741  ;;  %v4904_v5 = vadd.f32 1.0, %v6740_v44 }
 0x385   :  { %v6744_v6 = vpop.eup %6743  ;;  %6745 = vrcp.f32 %v4902_v47  ;;  %v4903_v7 = vadd.f32 1.0, %v6742_v4 }
 0x386   :  { %6747 = vrcp.f32 %v4904_v5  ;;  %v4905_v8 = vadd.f32 1.0, %v6744_v6 }
 0x387   :  { %6749 = vrcp.f32 %v4903_v7 }
 0x388   :  { %6751 = vrcp.f32 %v4905_v8 }
 0x38f   :  { %v6746_v13 = vpop.eup %6745 }
 0x390   :  { %v6748_v14 = vpop.eup %6747 }
 0x391   :  { %v6750_v16 = vpop.eup %6749 }
 0x392   :  { %v6752_v17 = vpop.eup %6751  ;;  %v5017_v18 = vcombine.low %v6746_v13, %v6750_v16 }
 0x393   :  { %v5018_v19 = vcombine.low %v6748_v14, %v6752_v17 }
 0x394   :  { %v5025_v20 = vrot.slane %v5017_v18, %v8010_v46  ;;  %v5709_v22 = vpop.f32.mrb[20].mxu1 }
 0x395   :  { %v5032_v23 = vrot.slane %v5018_v19, %v8010_v46  ;;  %v5710_v24 = vpop.f32.mrb[21].mxu1 }
 0x396   :  { %v5711_v26 = vadd.f32 %v5710_v24, %v5709_v22  ;;  %v5712_v27 = vpop.f32.mrb[22].mxu1 }
 0x397   :  { %v5033_v28 = vcombine.low %v5025_v20, %v5032_v23  ;;  %v5713_v32 = vpop.f32.mrb[23].mxu1 }
 0x398   :  { %v4788_v35 = vadd.f32 %v5711_v26, %v923_v29 }
 0x399   :  { %5058 = vst [vmem:[%s8809_s5 + $0x18] sm:$0xff] %v5033_v28 }
 0x3b4   :  { %v5731_v33 = vpop.f32.mrb[24].mxu1 }
 0x3b5   :  { %v5732_v34 = vpop.f32.mrb[25].mxu1 }
 0x3b6   :  { %v5733_v36 = vadd.f32 %v5732_v34, %v5731_v33  ;;  %v5734_v25 = vpop.f32.mrb[26].mxu1 }
 0x3b7   :  { %v5735_v39 = vpop.f32.mrb[27].mxu1 }
 0x3b8   :  { %v4828_v31 = vadd.f32 %v5733_v36, %v4788_v35 }
 0x3ba   :  { %v5692_v37 = vmul.f32 -1.442695, %v4828_v31 }
 0x3bc   :  { %6753 = vpow2.f32 %v5692_v37 }
 0x3c6   :  { %v6754_v55 = vpop.eup %6753 }
 0x3c7   :  { %v4908_v56 = vadd.f32 1.0, %v6754_v55 }
 0x3f3   :  { %v4746_v48 = vpop.f32.mrb[16].mxu0 }
 0x3f4   :  { %v5753_v49 = vadd.f32 %v4746_v48, %v915_v43  ;;  %v4748_v50 = vpop.f32.mrb[17].mxu0 }
 0x3f5   :  { %v5754_v51 = vadd.f32 %v4748_v50, %v919_v45  ;;  %v4750_v52 = vpop.f32.mrb[18].mxu0 }
 0x3f6   :  { %v5690_v53 = vmul.f32 -1.442695, %v5753_v49  ;;  %v4751_v21 = vpop.f32.mrb[19].mxu0 }
 0x3f7   :  { %v5691_v54 = vmul.f32 -1.442695, %v5754_v51 }
 0x3f8   :  { %6755 = vpow2.f32 %v5690_v53 }
 0x3f9   :  { %6757 = vpow2.f32 %v5691_v54 }
 0x3fa   :  { %6759 = vrcp.f32 %v4908_v56 }
 0x402   :  { %v6756_v57 = vpop.eup %6755 }
 0x403   :  { %v6758_v58 = vpop.eup %6757  ;;  %v4906_v59 = vadd.f32 1.0, %v6756_v57 }
 0x404   :  { %v4907_v11 = vadd.f32 1.0, %v6758_v58  ;;  %v6760_v12 = vpop.eup %6759 }
 0x405   :  { %6761 = vrcp.f32 %v4906_v59  ;;  %v5048_v61 = vrot.slane %v6760_v12, %v8010_v46 }
 0x406   :  { %6763 = vrcp.f32 %v4907_v11 }
 0x40f   :  { %v6762_v30 = vpop.eup %6761 }
 0x410   :  { %v6764_v42 = vpop.eup %6763 }
 0x411   :  { %v5034_v60 = vcombine.low %v6762_v30, %v6764_v42 }
 0x413   :  { %v5041_v62 = vrot.slane %v5034_v60, %v8010_v46 }
 0x415   :  { %v5049_v38 = vcombine.low %v5041_v62, %v5048_v61 }
 0x417   :  { %5059 = vst [vmem:[%s8809_s5 + $0x20] sm:$0x3f] %v5049_v38 }

</bundles_post_ra>
